<compile_context>
chip_gen: v7x
topology: tpu7x:2x2x1
jax: 0.10.0
libtpu: 0.0.40
codegen_flags: <defaults>
</compile_context>

<pallas_src>
import functools

import jax
import jax.numpy as jnp
from jax import lax
from jax.experimental import pallas as pl
from jax.experimental.pallas import tpu as pltpu


# ----------------------------------------------------------------------------
# Pallas kernel 1: gridded (M, K) @ (K, N) + bias + ReLU for the conv path.
# ----------------------------------------------------------------------------
def _matmul_bias_relu_kernel(x_ref, w_ref, b_ref, o_ref):
    y = jnp.dot(x_ref[...], w_ref[...], preferred_element_type=jnp.float32)
    y = y + b_ref[...]
    o_ref[...] = jnp.maximum(y, 0.0).astype(o_ref.dtype)


def conv_matmul_relu(patches, w2, b2, *, tm=512):
    M, K = patches.shape
    K2, N = w2.shape
    assert K == K2, (patches.shape, w2.shape)
    TM = min(tm, M)
    grid = (pl.cdiv(M, TM),)
    return pl.pallas_call(
        _matmul_bias_relu_kernel,
        out_shape=jax.ShapeDtypeStruct((M, N), jnp.float32),
        grid=grid,
        in_specs=[
            pl.BlockSpec((TM, K), lambda i: (i, 0)),
            pl.BlockSpec((K, N), lambda i: (0, 0)),   # weight stays resident
            pl.BlockSpec((1, N), lambda i: (0, 0)),   # bias stays resident
        ],
        out_specs=pl.BlockSpec((TM, N), lambda i: (i, 0)),
        compiler_params=pltpu.CompilerParams(
            dimension_semantics=("parallel",)),
    )(patches, w2, b2)


# ----------------------------------------------------------------------------
# Pallas kernel 2: fully fused post-encoder head (action encoders + critics).
# All weights/activations stay in VMEM; twin streams stacked along N.
# ----------------------------------------------------------------------------
def _fused_head_kernel(*refs, n_mid):
    if n_mid > 0:
        (obs_ref, act_ref, wa1, ba1, wa2, ba2,
         wc0_obs, wc0_act, bc0, wmid, bmid, whead, bhead, o_ref) = refs
    else:
        (obs_ref, act_ref, wa1, ba1, wa2, ba2,
         wc0_obs, wc0_act, bc0, whead, bhead, o_ref) = refs
        wmid = bmid = None

    f32 = jnp.float32
    # Stacked action encoders: a = [a1 | a2], shape (B, 2H).
    a = jnp.dot(act_ref[...], wa1[...], preferred_element_type=f32) + ba1[...]
    a = jnp.maximum(a, 0.0)
    a = jnp.dot(a, wa2[...], preferred_element_type=f32) + ba2[...]
    a = jnp.maximum(a, 0.0)

    # Critic layer 0: concat replaced by two accumulated matmuls in VMEM.
    h = jnp.dot(obs_ref[...], wc0_obs[...], preferred_element_type=f32)
    h = h + jnp.dot(a, wc0_act[...], preferred_element_type=f32) + bc0[...]
    h = jnp.maximum(h, 0.0)

    # Middle critic layers (block-diagonal => both critics in one matmul).
    for i in range(n_mid):
        h = jnp.dot(h, wmid[i], preferred_element_type=f32) + bmid[i]
        h = jnp.maximum(h, 0.0)

    # Lane-dense stacked Q head: col 0 = q1, col 1 = q2, rest zero padding.
    q = jnp.dot(h, whead[...], preferred_element_type=f32) + bhead[...]
    o_ref[...] = q.astype(o_ref.dtype)


def _full_spec(arr):
    nd = arr.ndim
    return pl.BlockSpec(arr.shape, lambda *_, nd=nd: (0,) * nd)


def fused_head(prep, obs_feat, action):
    B = obs_feat.shape[0]
    n_mid = prep["wmid"].shape[0] if "wmid" in prep else 0

    args = [obs_feat, action,
            prep["wa1"], prep["ba1"], prep["wa2"], prep["ba2"],
            prep["wc0_obs"], prep["wc0_act"], prep["bc0"]]
    if n_mid > 0:
        args += [prep["wmid"], prep["bmid"]]
    args += [prep["whead"], prep["bhead"]]

    n_pad = prep["whead"].shape[1]
    return pl.pallas_call(
        functools.partial(_fused_head_kernel, n_mid=n_mid),
        out_shape=jax.ShapeDtypeStruct((B, n_pad), jnp.float32),
        in_specs=[_full_spec(a) for a in args],
        out_specs=pl.BlockSpec((B, n_pad), lambda: (0, 0)),
    )(*args)


# ----------------------------------------------------------------------------
# Conv2d(k=3, s=2, p=1) via im2col (glue) + Pallas matmul (hot path).
# ----------------------------------------------------------------------------
def _im2col(x, ksize=3, stride=2, pad=1):
    # x: (B, H, W, C) -> patches (B*oh*ow, 9*C), patch K-order (kh, kw, c).
    B, H, W, C = x.shape
    xp = jnp.pad(x, ((0, 0), (pad, pad), (pad, pad), (0, 0)))
    oh = (H + 2 * pad - ksize) // stride + 1
    ow = (W + 2 * pad - ksize) // stride + 1
    patches = []
    for kh in range(ksize):
        for kw in range(ksize):
            sl = xp[:, kh:kh + stride * (oh - 1) + 1:stride,
                       kw:kw + stride * (ow - 1) + 1:stride, :]
            patches.append(sl)
    p = jnp.stack(patches, axis=3)                       # (B, oh, ow, 9, C)
    return p.reshape(B * oh * ow, ksize * ksize * C), (B, oh, ow)


def conv2d_relu(x, w2, b2):
    patches, (B, oh, ow) = _im2col(x)
    cout = w2.shape[1]
    y = conv_matmul_relu(patches, w2, b2)
    return y.reshape(B, oh, ow, cout)


# ----------------------------------------------------------------------------
# Forward pass
# ----------------------------------------------------------------------------
def _conv_out(s):
    return (s + 2 - 3) // 2 + 1


def cnn_critic_forward(prep, obs, action):
    h = conv2d_relu(obs, prep["conv1_w2"], prep["conv1_b2"])
    h = conv2d_relu(h, prep["conv2_w2"], prep["conv2_b2"])
    B = h.shape[0]
    obs_feat = h.reshape(B, -1)   # NHWC flatten; NCHW transpose folded into W
    out = fused_head(prep, obs_feat, action)
    return out[:, 0:1], out[:, 1:2]


# ----------------------------------------------------------------------------
# One-time parameter prep: fold transpose into weights, stack twin streams.
# ----------------------------------------------------------------------------
def _block_diag(w1, w2):
    r1, c1 = w1.shape
    r2, c2 = w2.shape
    top = jnp.concatenate([w1, jnp.zeros((r1, c2), w1.dtype)], axis=1)
    bot = jnp.concatenate([jnp.zeros((r2, c1), w2.dtype), w2], axis=1)
    return jnp.concatenate([top, bot], axis=0)


def prepare_params(params, obs_shape):
    H, W, C = obs_shape
    hd = params["conv1_w"].shape[3]        # hidden_dim
    cout2 = params["conv2_w"].shape[3]     # 2 * hidden_dim
    oh = _conv_out(_conv_out(H))
    ow = _conv_out(_conv_out(W))
    enc_out = cout2 * oh * ow

    prep = {}
    # Conv weights flattened to matmul form (K-order (kh, kw, cin)).
    prep["conv1_w2"] = params["conv1_w"].reshape(-1, hd)
    prep["conv1_b2"] = params["conv1_b"].reshape(1, -1)
    prep["conv2_w2"] = params["conv2_w"].reshape(-1, cout2)
    prep["conv2_b2"] = params["conv2_b"].reshape(1, -1)

    # Row permutation mapping NHWC-flat index j -> NCHW-flat index i, so
    # obs_feat_nhwc @ W[perm] == obs_feat_nchw @ W (transpose folded away).
    perm = jnp.transpose(
        jnp.arange(enc_out).reshape(cout2, oh, ow), (1, 2, 0)).reshape(-1)

    # Action encoders, stacked along N.
    (w11, b11), (w12, b12) = params["act_enc1"]
    (w21, b21), (w22, b22) = params["act_enc2"]
    prep["wa1"] = jnp.concatenate([w11, w21], axis=1)          # (A, 2H)
    prep["ba1"] = jnp.concatenate([b11, b21])[None, :]
    prep["wa2"] = _block_diag(w12, w22)                        # (2H, 2H)
    prep["ba2"] = jnp.concatenate([b12, b22])[None, :]

    # Critic layer 0, split (obs / action) and stacked along N.
    c1, c2 = params["critic1"], params["critic2"]
    w1_0, b1_0 = c1[0]
    w2_0, b2_0 = c2[0]
    prep["wc0_obs"] = jnp.concatenate(
        [w1_0[:enc_out][perm], w2_0[:enc_out][perm]], axis=1)  # (enc_out, 2H)
    prep["wc0_act"] = _block_diag(w1_0[enc_out:], w2_0[enc_out:])
    prep["bc0"] = jnp.concatenate([b1_0, b2_0])[None, :]

    # Middle critic layers as block-diagonal stacks.
    n_mid = len(c1) - 2
    if n_mid > 0:
        prep["wmid"] = jnp.stack(
            [_block_diag(c1[1 + i][0], c2[1 + i][0]) for i in range(n_mid)])
        prep["bmid"] = jnp.stack(
            [jnp.concatenate([c1[1 + i][1], c2[1 + i][1]])[None, :]
             for i in range(n_mid)])

    # Q heads stacked into one lane-dense (padded to 128) output matmul.
    w1_h, b1_h = c1[-1]
    w2_h, b2_h = c2[-1]
    n_pad = 128
    whead = jnp.zeros((2 * hd, n_pad), jnp.float32)
    whead = whead.at[:hd, 0].set(w1_h[:, 0]).at[hd:, 1].set(w2_h[:, 0])
    bhead = jnp.zeros((1, n_pad), jnp.float32)
    bhead = bhead.at[0, 0].set(b1_h[0]).at[0, 1].set(b2_h[0])
    prep["whead"] = whead
    prep["bhead"] = bhead
    return prep


# ----------------------------------------------------------------------------
# Deterministic parameter init (PyTorch-style uniform(-1/sqrt(fan_in), ...)).
# ----------------------------------------------------------------------------
def _linear_init(key, fan_in, fan_out):
    k1, k2 = jax.random.split(key)
    bound = 1.0 / (fan_in ** 0.5)
    w = jax.random.uniform(k1, (fan_in, fan_out), jnp.float32, -bound, bound)
    b = jax.random.uniform(k2, (fan_out,), jnp.float32, -bound, bound)
    return w, b


def init_params(key, obs_shape, action_dim, hidden_dim, n_layers):
    H, W, C = obs_shape
    keys = iter(jax.random.split(key, 32))

    def conv_init(k, cin, cout):
        k1, k2 = jax.random.split(k)
        fan_in = cin * 9
        bound = 1.0 / (fan_in ** 0.5)
        w = jax.random.uniform(k1, (3, 3, cin, cout), jnp.float32, -bound, bound)
        b = jax.random.uniform(k2, (cout,), jnp.float32, -bound, bound)
        return w, b

    params = {}
    params["conv1_w"], params["conv1_b"] = conv_init(next(keys), C, hidden_dim)
    params["conv2_w"], params["conv2_b"] = conv_init(next(keys), hidden_dim,
                                                     hidden_dim * 2)

    oh = _conv_out(_conv_out(H))
    ow = _conv_out(_conv_out(W))
    enc_out = hidden_dim * 2 * oh * ow

    def action_encoder():
        return [_linear_init(next(keys), action_dim, hidden_dim),
                _linear_init(next(keys), hidden_dim, hidden_dim)]

    def critic():
        layers = [_linear_init(next(keys), enc_out + hidden_dim, hidden_dim)]
        for _ in range(n_layers - 1):
            layers.append(_linear_init(next(keys), hidden_dim, hidden_dim))
        layers.append(_linear_init(next(keys), hidden_dim, 1))
        return layers

    params["act_enc1"] = action_encoder()
    params["act_enc2"] = action_encoder()
    params["critic1"] = critic()
    params["critic2"] = critic()
    return params


# ----------------------------------------------------------------------------
# Pure-JAX reference (PyTorch semantics: NCHW flatten, explicit concat).
# ----------------------------------------------------------------------------
def reference_forward(params, obs, action):
    def conv(x, w, b):
        y = lax.conv_general_dilated(
            x, w, window_strides=(2, 2), padding=[(1, 1), (1, 1)],
            dimension_numbers=("NHWC", "HWIO", "NHWC"))
        return jax.nn.relu(y + b)

    h = conv(obs, params["conv1_w"], params["conv1_b"])
    h = conv(h, params["conv2_w"], params["conv2_b"])
    B = h.shape[0]
    obs_feat = jnp.transpose(h, (0, 3, 1, 2)).reshape(B, -1)

    def dense(x, w, b, relu):
        y = x @ w + b
        return jax.nn.relu(y) if relu else y

    def mlp_relu(layers, x):
        for w, b in layers:
            x = dense(x, w, b, True)
        return x

    def critic(layers, x):
        for w, b in layers[:-1]:
            x = dense(x, w, b, True)
        w, b = layers[-1]
        return dense(x, w, b, False)

    a1 = mlp_relu(params["act_enc1"], action)
    a2 = mlp_relu(params["act_enc2"], action)
    q1 = critic(params["critic1"], jnp.concatenate([obs_feat, a1], axis=-1))
    q2 = critic(params["critic2"], jnp.concatenate([obs_feat, a2], axis=-1))
    return q1, q2


if __name__ == "__main__":
    batch = 2
    obs_shape = (16, 16, 4)     # (H, W, C) — NHWC observations
    action_dim = 6
    hidden_dim = 32
    n_layers = 2

    key = jax.random.PRNGKey(0)
    kp, ko, ka = jax.random.split(key, 3)
    params = init_params(kp, obs_shape, action_dim, hidden_dim, n_layers)
    prep = prepare_params(params, obs_shape)   # one-time weight folding/stacking

    obs = jax.random.normal(ko, (batch, *obs_shape), jnp.float32)
    action = jax.random.normal(ka, (batch, action_dim), jnp.float32)

    fwd = jax.jit(cnn_critic_forward)
    q1, q2 = fwd(prep, obs, action)
    q1 = jax.block_until_ready(q1)
    q2 = jax.block_until_ready(q2)

    r1, r2 = reference_forward(params, obs, action)
    assert q1.shape == (batch, 1) and q2.shape == (batch, 1)
    assert jnp.allclose(q1, r1, rtol=1e-3, atol=1e-3), (q1, r1)
    assert jnp.allclose(q2, r2, rtol=1e-3, atol=1e-3), (q2, r2)

    print("KERNEL_OK")
</pallas_src>

<mosaic_0001>
module attributes {stable_mosaic.version = 11 : i64} {
  func.func @_matmul_bias_relu_kernel(%arg0: i32, %arg1: memref<128x36xf32, #tpu.memory_space<vmem>>, %arg2: memref<36x32xf32, #tpu.memory_space<vmem>>, %arg3: memref<1x32xf32, #tpu.memory_space<vmem>>, %arg4: memref<128x32xf32, #tpu.memory_space<vmem>>) attributes {dimension_semantics = [#tpu.dimension_semantics<parallel>], iteration_bounds = array<i64: 1>, scalar_prefetch = 0 : i64, scratch_operands = 0 : i64, tpu.core_type = #tpu.core_type<tc>, window_params = [{transform_indices = @transform_0, window_bounds = array<i64: 128, 36>}, {pipeline_mode = #tpu.pipeline_mode<synchronous>, transform_indices = @transform_1, window_bounds = array<i64: 36, 32>}, {pipeline_mode = #tpu.pipeline_mode<synchronous>, transform_indices = @transform_2, window_bounds = array<i64: 1, 32>}, {transform_indices = @transform_3, window_bounds = array<i64: 128, 32>}]} {
    %c0 = arith.constant 0 : index
    %c0_0 = arith.constant 0 : index
    %0 = vector.load %arg1[%c0, %c0_0] : memref<128x36xf32, #tpu.memory_space<vmem>>, vector<128x36xf32>
    %c0_1 = arith.constant 0 : index
    %c0_2 = arith.constant 0 : index
    %1 = vector.load %arg2[%c0_1, %c0_2] : memref<36x32xf32, #tpu.memory_space<vmem>>, vector<36x32xf32>
    %cst = arith.constant dense<0.000000e+00> : vector<128x32xf32>
    %2 = tpu.matmul %0, %1, %cst {dimension_numbers = #tpu.dot_dimension_numbers<[1], [0], [0], [1], [0, 0, 1, 1], [], []>} : vector<128x36xf32>, vector<36x32xf32>, vector<128x32xf32> -> vector<128x32xf32>
    %c0_3 = arith.constant 0 : index
    %c0_4 = arith.constant 0 : index
    %3 = vector.load %arg3[%c0_3, %c0_4] : memref<1x32xf32, #tpu.memory_space<vmem>>, vector<1x32xf32>
    %4 = vector.broadcast %3 : vector<1x32xf32> to vector<128x32xf32>
    %5 = arith.addf %2, %4 : vector<128x32xf32>
    %cst_5 = arith.constant 0.000000e+00 : f32
    %6 = vector.broadcast %cst_5 : f32 to vector<128x32xf32>
    %7 = arith.maximumf %5, %6 : vector<128x32xf32>
    %c0_6 = arith.constant 0 : index
    %c0_7 = arith.constant 0 : index
    %8 = vector.load %arg4[%c0_6, %c0_7] : memref<128x32xf32, #tpu.memory_space<vmem>>, vector<128x32xf32>
    tpu.vector_store %arg4[%c0_6, %c0_7], %7 {strides = array<i32>} : memref<128x32xf32, #tpu.memory_space<vmem>>, vector<128x32xf32>,
    return
  }
  func.func @transform_0(%arg0: i32) -> (i32, i32) {
    %c0_i32 = arith.constant 0 : i32
    %c0_i32_0 = arith.constant 0 : i32
    return %arg0, %c0_i32 : i32, i32
  }
  func.func @transform_1(%arg0: i32) -> (i32, i32) {
    %c0_i32 = arith.constant 0 : i32
    %c0_i32_0 = arith.constant 0 : i32
    %c0_i32_1 = arith.constant 0 : i32
    return %c0_i32, %c0_i32_0 : i32, i32
  }
  func.func @transform_2(%arg0: i32) -> (i32, i32) {
    %c0_i32 = arith.constant 0 : i32
    %c0_i32_0 = arith.constant 0 : i32
    %c0_i32_1 = arith.constant 0 : i32
    return %c0_i32, %c0_i32_0 : i32, i32
  }
  func.func @transform_3(%arg0: i32) -> (i32, i32) {
    %c0_i32 = arith.constant 0 : i32
    %c0_i32_0 = arith.constant 0 : i32
    return %arg0, %c0_i32 : i32, i32
  }
}

module attributes {stable_mosaic.version = 11 : i64} {
  func.func @_matmul_bias_relu_kernel(%arg0: i32, %arg1: memref<32x288xf32, #tpu.memory_space<vmem>>, %arg2: memref<288x64xf32, #tpu.memory_space<vmem>>, %arg3: memref<1x64xf32, #tpu.memory_space<vmem>>, %arg4: memref<32x64xf32, #tpu.memory_space<vmem>>) attributes {dimension_semantics = [#tpu.dimension_semantics<parallel>], iteration_bounds = array<i64: 1>, scalar_prefetch = 0 : i64, scratch_operands = 0 : i64, tpu.core_type = #tpu.core_type<tc>, window_params = [{transform_indices = @transform_0, window_bounds = array<i64: 32, 288>}, {pipeline_mode = #tpu.pipeline_mode<synchronous>, transform_indices = @transform_1, window_bounds = array<i64: 288, 64>}, {pipeline_mode = #tpu.pipeline_mode<synchronous>, transform_indices = @transform_2, window_bounds = array<i64: 1, 64>}, {transform_indices = @transform_3, window_bounds = array<i64: 32, 64>}]} {
    %c0 = arith.constant 0 : index
    %c0_0 = arith.constant 0 : index
    %0 = vector.load %arg1[%c0, %c0_0] : memref<32x288xf32, #tpu.memory_space<vmem>>, vector<32x288xf32>
    %c0_1 = arith.constant 0 : index
    %c0_2 = arith.constant 0 : index
    %1 = vector.load %arg2[%c0_1, %c0_2] : memref<288x64xf32, #tpu.memory_space<vmem>>, vector<288x64xf32>
    %cst = arith.constant dense<0.000000e+00> : vector<32x64xf32>
    %2 = tpu.matmul %0, %1, %cst {dimension_numbers = #tpu.dot_dimension_numbers<[1], [0], [0], [1], [0, 0, 1, 1], [], []>} : vector<32x288xf32>, vector<288x64xf32>, vector<32x64xf32> -> vector<32x64xf32>
    %c0_3 = arith.constant 0 : index
    %c0_4 = arith.constant 0 : index
    %3 = vector.load %arg3[%c0_3, %c0_4] : memref<1x64xf32, #tpu.memory_space<vmem>>, vector<1x64xf32>
    %4 = vector.broadcast %3 : vector<1x64xf32> to vector<32x64xf32>
    %5 = arith.addf %2, %4 : vector<32x64xf32>
    %cst_5 = arith.constant 0.000000e+00 : f32
    %6 = vector.broadcast %cst_5 : f32 to vector<32x64xf32>
    %7 = arith.maximumf %5, %6 : vector<32x64xf32>
    %c0_6 = arith.constant 0 : index
    %c0_7 = arith.constant 0 : index
    %8 = vector.load %arg4[%c0_6, %c0_7] : memref<32x64xf32, #tpu.memory_space<vmem>>, vector<32x64xf32>
    tpu.vector_store %arg4[%c0_6, %c0_7], %7 {strides = array<i32>} : memref<32x64xf32, #tpu.memory_space<vmem>>, vector<32x64xf32>,
    return
  }
  func.func @transform_0(%arg0: i32) -> (i32, i32) {
    %c0_i32 = arith.constant 0 : i32
    %c0_i32_0 = arith.constant 0 : i32
    return %arg0, %c0_i32 : i32, i32
  }
  func.func @transform_1(%arg0: i32) -> (i32, i32) {
    %c0_i32 = arith.constant 0 : i32
    %c0_i32_0 = arith.constant 0 : i32
    %c0_i32_1 = arith.constant 0 : i32
    return %c0_i32, %c0_i32_0 : i32, i32
  }
  func.func @transform_2(%arg0: i32) -> (i32, i32) {
    %c0_i32 = arith.constant 0 : i32
    %c0_i32_0 = arith.constant 0 : i32
    %c0_i32_1 = arith.constant 0 : i32
    return %c0_i32, %c0_i32_0 : i32, i32
  }
  func.func @transform_3(%arg0: i32) -> (i32, i32) {
    %c0_i32 = arith.constant 0 : i32
    %c0_i32_0 = arith.constant 0 : i32
    return %arg0, %c0_i32 : i32, i32
  }
}

module attributes {stable_mosaic.version = 11 : i64} {
  func.func @_fused_head_kernel(%arg0: memref<2x1024xf32, #tpu.memory_space<vmem>>, %arg1: memref<2x6xf32, #tpu.memory_space<vmem>>, %arg2: memref<6x64xf32, #tpu.memory_space<vmem>>, %arg3: memref<1x64xf32, #tpu.memory_space<vmem>>, %arg4: memref<64x64xf32, #tpu.memory_space<vmem>>, %arg5: memref<1x64xf32, #tpu.memory_space<vmem>>, %arg6: memref<1024x64xf32, #tpu.memory_space<vmem>>, %arg7: memref<64x64xf32, #tpu.memory_space<vmem>>, %arg8: memref<1x64xf32, #tpu.memory_space<vmem>>, %arg9: memref<1x64x64xf32, #tpu.memory_space<vmem>>, %arg10: memref<1x1x64xf32, #tpu.memory_space<vmem>>, %arg11: memref<64x128xf32, #tpu.memory_space<vmem>>, %arg12: memref<1x128xf32, #tpu.memory_space<vmem>>, %arg13: memref<2x128xf32, #tpu.memory_space<vmem>>) attributes {dimension_semantics = [], scalar_prefetch = 0 : i64, scratch_operands = 0 : i64, tpu.core_type = #tpu.core_type<tc>} {
    %c0 = arith.constant 0 : index
    %c0_0 = arith.constant 0 : index
    %0 = vector.load %arg1[%c0, %c0_0] : memref<2x6xf32, #tpu.memory_space<vmem>>, vector<2x6xf32>
    %c0_1 = arith.constant 0 : index
    %c0_2 = arith.constant 0 : index
    %1 = vector.load %arg2[%c0_1, %c0_2] : memref<6x64xf32, #tpu.memory_space<vmem>>, vector<6x64xf32>
    %cst = arith.constant dense<0.000000e+00> : vector<2x64xf32>
    %2 = tpu.matmul %0, %1, %cst {dimension_numbers = #tpu.dot_dimension_numbers<[1], [0], [0], [1], [0, 0, 1, 1], [], []>} : vector<2x6xf32>, vector<6x64xf32>, vector<2x64xf32> -> vector<2x64xf32>
    %c0_3 = arith.constant 0 : index
    %c0_4 = arith.constant 0 : index
    %3 = vector.load %arg3[%c0_3, %c0_4] : memref<1x64xf32, #tpu.memory_space<vmem>>, vector<1x64xf32>
    %4 = vector.broadcast %3 : vector<1x64xf32> to vector<2x64xf32>
    %5 = arith.addf %2, %4 : vector<2x64xf32>
    %cst_5 = arith.constant 0.000000e+00 : f32
    %6 = vector.broadcast %cst_5 : f32 to vector<2x64xf32>
    %7 = arith.maximumf %5, %6 : vector<2x64xf32>
    %c0_6 = arith.constant 0 : index
    %c0_7 = arith.constant 0 : index
    %8 = vector.load %arg4[%c0_6, %c0_7] : memref<64x64xf32, #tpu.memory_space<vmem>>, vector<64x64xf32>
    %cst_8 = arith.constant dense<0.000000e+00> : vector<2x64xf32>
    %9 = tpu.matmul %7, %8, %cst_8 {dimension_numbers = #tpu.dot_dimension_numbers<[1], [0], [0], [1], [0, 0, 1, 1], [], []>} : vector<2x64xf32>, vector<64x64xf32>, vector<2x64xf32> -> vector<2x64xf32>
    %c0_9 = arith.constant 0 : index
    %c0_10 = arith.constant 0 : index
    %10 = vector.load %arg5[%c0_9, %c0_10] : memref<1x64xf32, #tpu.memory_space<vmem>>, vector<1x64xf32>
    %11 = vector.broadcast %10 : vector<1x64xf32> to vector<2x64xf32>
    %12 = arith.addf %9, %11 : vector<2x64xf32>
    %cst_11 = arith.constant 0.000000e+00 : f32
    %13 = vector.broadcast %cst_11 : f32 to vector<2x64xf32>
    %14 = arith.maximumf %12, %13 : vector<2x64xf32>
    %c0_12 = arith.constant 0 : index
    %c0_13 = arith.constant 0 : index
    %15 = vector.load %arg0[%c0_12, %c0_13] : memref<2x1024xf32, #tpu.memory_space<vmem>>, vector<2x1024xf32>
    %c0_14 = arith.constant 0 : index
    %c0_15 = arith.constant 0 : index
    %16 = vector.load %arg6[%c0_14, %c0_15] : memref<1024x64xf32, #tpu.memory_space<vmem>>, vector<1024x64xf32>
    %cst_16 = arith.constant dense<0.000000e+00> : vector<2x64xf32>
    %17 = tpu.matmul %15, %16, %cst_16 {dimension_numbers = #tpu.dot_dimension_numbers<[1], [0], [0], [1], [0, 0, 1, 1], [], []>} : vector<2x1024xf32>, vector<1024x64xf32>, vector<2x64xf32> -> vector<2x64xf32>
    %c0_17 = arith.constant 0 : index
    %c0_18 = arith.constant 0 : index
    %18 = vector.load %arg7[%c0_17, %c0_18] : memref<64x64xf32, #tpu.memory_space<vmem>>, vector<64x64xf32>
    %cst_19 = arith.constant dense<0.000000e+00> : vector<2x64xf32>
    %19 = tpu.matmul %14, %18, %cst_19 {dimension_numbers = #tpu.dot_dimension_numbers<[1], [0], [0], [1], [0, 0, 1, 1], [], []>} : vector<2x64xf32>, vector<64x64xf32>, vector<2x64xf32> -> vector<2x64xf32>
    %20 = arith.addf %17, %19 : vector<2x64xf32>
    %c0_20 = arith.constant 0 : index
    %c0_21 = arith.constant 0 : index
    %21 = vector.load %arg8[%c0_20, %c0_21] : memref<1x64xf32, #tpu.memory_space<vmem>>, vector<1x64xf32>
    %22 = vector.broadcast %21 : vector<1x64xf32> to vector<2x64xf32>
    %23 = arith.addf %20, %22 : vector<2x64xf32>
    %cst_22 = arith.constant 0.000000e+00 : f32
    %24 = vector.broadcast %cst_22 : f32 to vector<2x64xf32>
    %25 = arith.maximumf %23, %24 : vector<2x64xf32>
    %c0_23 = arith.constant 0 : index
    %c0_24 = arith.constant 0 : index
    %c0_25 = arith.constant 0 : index
    %26 = vector.load %arg9[%c0_23, %c0_24, %c0_25] : memref<1x64x64xf32, #tpu.memory_space<vmem>>, vector<1x64x64xf32>
    %27 = vector.shape_cast %26 : vector<1x64x64xf32> to vector<64x64xf32>
    %cst_26 = arith.constant dense<0.000000e+00> : vector<2x64xf32>
    %28 = tpu.matmul %25, %27, %cst_26 {dimension_numbers = #tpu.dot_dimension_numbers<[1], [0], [0], [1], [0, 0, 1, 1], [], []>} : vector<2x64xf32>, vector<64x64xf32>, vector<2x64xf32> -> vector<2x64xf32>
    %c0_27 = arith.constant 0 : index
    %c0_28 = arith.constant 0 : index
    %c0_29 = arith.constant 0 : index
    %29 = vector.load %arg10[%c0_27, %c0_28, %c0_29] : memref<1x1x64xf32, #tpu.memory_space<vmem>>, vector<1x1x64xf32>
    %30 = vector.shape_cast %29 : vector<1x1x64xf32> to vector<1x64xf32>
    %31 = vector.broadcast %30 : vector<1x64xf32> to vector<2x64xf32>
    %32 = arith.addf %28, %31 : vector<2x64xf32>
    %cst_30 = arith.constant 0.000000e+00 : f32
    %33 = vector.broadcast %cst_30 : f32 to vector<2x64xf32>
    %34 = arith.maximumf %32, %33 : vector<2x64xf32>
    %c0_31 = arith.constant 0 : index
    %c0_32 = arith.constant 0 : index
    %35 = vector.load %arg11[%c0_31, %c0_32] : memref<64x128xf32, #tpu.memory_space<vmem>>, vector<64x128xf32>
    %cst_33 = arith.constant dense<0.000000e+00> : vector<2x128xf32>
    %36 = tpu.matmul %34, %35, %cst_33 {dimension_numbers = #tpu.dot_dimension_numbers<[1], [0], [0], [1], [0, 0, 1, 1], [], []>} : vector<2x64xf32>, vector<64x128xf32>, vector<2x128xf32> -> vector<2x128xf32>
    %c0_34 = arith.constant 0 : index
    %c0_35 = arith.constant 0 : index
    %37 = vector.load %arg12[%c0_34, %c0_35] : memref<1x128xf32, #tpu.memory_space<vmem>>, vector<1x128xf32>
    %38 = vector.broadcast %37 : vector<1x128xf32> to vector<2x128xf32>
    %39 = arith.addf %36, %38 : vector<2x128xf32>
    %c0_36 = arith.constant 0 : index
    %c0_37 = arith.constant 0 : index
    %40 = vector.load %arg13[%c0_36, %c0_37] : memref<2x128xf32, #tpu.memory_space<vmem>>, vector<2x128xf32>
    tpu.vector_store %arg13[%c0_36, %c0_37], %39 {strides = array<i32>} : memref<2x128xf32, #tpu.memory_space<vmem>>, vector<2x128xf32>,
    return
  }
}

</mosaic_0001>

<bundles_post_ra>
// kernel: cnn_critic_forward.3
= control target key start
LH: loop header
LB: loop body
LE: loop exit
PB: predicated region body
PF: predicated region fallthrough
CT: control target
= control target key end

     0   :  { %vm42_vm0 = vcmask 293888   ;;  %vm91_vm1 = vcmask 1043456   ;;  %vm256_vm2 = vcmask 261120   ;;  %s530_s1 = inlined_call_operand.vmem [shape: f32[36,32], index: 1, kind: input, shape index: {}]   ;;  %s531_s0 = inlined_call_operand.vmem [shape: f32[128,36], index: 0, kind: input, shape index: {}]   ;;  %s532_s2 = inlined_call_operand.vmem [shape: f32[1,32], index: 2, kind: input, shape index: {}]   ;;  %s533_s3 = inlined_call_operand.vmem [shape: f32[128,32], index: 3, kind: output, shape index: {}]  }
   0x1   :  { %v30_v0 = vld [vmem:[%s530_s1] sm:$0xff]  ;;  %v31_v1 = vld [vmem:[%s530_s1 + $0x8] sm:$0xff]  ;;  %v32_v2 = vld [vmem:[%s530_s1 + $0x10] sm:$0xff] }
   0x2   :  { %v350_v3 = vpack.c.bf16 %v31_v1, %v30_v0  ;;  %v33_v4 = vld [vmem:[%s530_s1 + $0x18] sm:$0xff]  ;;  %v14_v5 = vld [vmem:[%s531_s0] sm:$0xff]  ;;  %v15_v9 = vld [vmem:[%s531_s0 + $0x8] sm:$0xff] }
   0x3   :  { %v354_v6 = vpack.c.bf16 %v33_v4, %v32_v2  ;;  %326 = vmatprep.mubr.msk.f32.mxu0 %vm42_vm0, %v14_v5  ;;  %v22_v7 = vld [vmem:[%s531_s0 + $0x40] sm:$0xff]  ;;  %v23_v10 = vld [vmem:[%s531_s0 + $0x48] sm:$0xff]  ;;  %v16_v11 = vld [vmem:[%s531_s0 + $0x10] sm:$0xff] }
   0x4   :  { %351 = vmatprep.subr.bf16.mxu0 %v350_v3  ;;  %358 = vmatprep.subr.bf16.mxu1 %v350_v3  ;;  %v34_v8 = vld [vmem:[%s530_s1 + $0x20] sm:$0xf]  ;;  %v24_v12 = vld [vmem:[%s531_s0 + $0x50] sm:$0xff]  ;;  %v17_v13 = vld [vmem:[%s531_s0 + $0x18] sm:$0xff] }
   0x5   :  { %353 = vmatpush3.bf16.msra.mxu0 %v350_v3  ;;  %361 = vmatpush3.bf16.msra.mxu1 %v350_v3  ;;  %v25_v14 = vld [vmem:[%s531_s0 + $0x58] sm:$0xff]  ;;  %v18_v15 = vld [vmem:[%s531_s0 + $0x20] sm:$0xff]  ;;  %v19_v17 = vld [vmem:[%s531_s0 + $0x28] sm:$0xff] }
   0x6   :  { %355 = vmatprep.subr.bf16.mxu0 %v354_v6  ;;  %359 = vmatprep.subr.bf16.mxu1 %v354_v6  ;;  %v26_v16 = vld [vmem:[%s531_s0 + $0x60] sm:$0xff]  ;;  %v27_v18 = vld [vmem:[%s531_s0 + $0x68] sm:$0xff]  ;;  %v20_v19 = vld [vmem:[%s531_s0 + $0x30] sm:$0xff] }
   0x7   :  { %338 = vmatprep.mubr.msk.f32.mxu1 %vm42_vm0, %v22_v7  ;;  %v28_v20 = vld [vmem:[%s531_s0 + $0x70] sm:$0xff]  ;;  %v21_v21 = vld [vmem:[%s531_s0 + $0x38] sm:$0xff]  ;;  %v277_v23 = vld [vmem:[%s532_s2] ss:$0 sm:$0xff] }
   0x8   :  { %v29_v22 = vld [vmem:[%s531_s0 + $0x78] sm:$0xff] }
   0x9   :  { %357 = vmatpush3.bf16.msra.mxu0 %v354_v6  ;;  %362 = vmatpush3.bf16.msra.mxu1 %v354_v6 }
   0xa   :  { %324 = vmatprep.subr.msk.mxu0 %vm91_vm1, %v34_v8  ;;  %360 = vmatprep.subr.msk.mxu1 %vm91_vm1, %v34_v8 }
   0xd   :  { %325 = vmatpush3.msk.msra.mxu0 %vm91_vm1, %v34_v8  ;;  %363 = vmatpush3.msk.msra.mxu1 %vm91_vm1, %v34_v8 }
   0xe   :  { %327 = vmatmul.mubr.msk.f32.vlgmr.msra.gmra.mrb[0].mxu0 %vm42_vm0, %v15_v9  ;;  %339 = vmatmul.mubr.msk.f32.vlgmr.msra.gmra.mrb[0].mxu1 %vm42_vm0, %v23_v10 }
   0xf   :  { %329 = vmatprep.mubr.msk.f32.mxu0 %vm42_vm0, %v16_v11  ;;  %341 = vmatprep.mubr.msk.f32.mxu1 %vm42_vm0, %v24_v12 }
  0x12   :  { %330 = vmatmul.mubr.msk.f32.gmra.mrb[2].mxu0 %vm42_vm0, %v17_v13  ;;  %342 = vmatmul.mubr.msk.f32.gmra.mrb[2].mxu1 %vm42_vm0, %v25_v14 }
  0x13   :  { %332 = vmatprep.mubr.msk.f32.mxu0 %vm42_vm0, %v18_v15  ;;  %344 = vmatprep.mubr.msk.f32.mxu1 %vm42_vm0, %v26_v16 }
  0x16   :  { %333 = vmatmul.mubr.msk.f32.gmra.mrb[4].mxu0 %vm42_vm0, %v19_v17  ;;  %345 = vmatmul.mubr.msk.f32.gmra.mrb[4].mxu1 %vm42_vm0, %v27_v18 }
  0x17   :  { %335 = vmatprep.mubr.msk.f32.mxu0 %vm42_vm0, %v20_v19  ;;  %347 = vmatprep.mubr.msk.f32.mxu1 %vm42_vm0, %v28_v20 }
  0x1a   :  { %336 = vmatmul.mubr.msk.f32.gmra.mrb[6].mxu0 %vm42_vm0, %v21_v21  ;;  %348 = vmatmul.mubr.msk.f32.gmra.mrb[6].mxu1 %vm42_vm0, %v29_v22 }
  0xe1   :  { %v328_v24 = vpop.f32.mrb[0].mxu0  ;;  %v340_v25 = vpop.f32.mrb[0].mxu1 }
  0xe2   :  { %v167_v26 = vadd.f32 %v328_v24, %v277_v23  ;;  %v207_v27 = vadd.f32 %v340_v25, %v277_v23  ;;  %v161_v28 = vpop.f32.mrb[1].mxu0  ;;  %v201_v29 = vpop.f32.mrb[1].mxu1 }
  0xe3   :  { %v162_v30 = vadd.f32 %v277_v23, %v161_v28  ;;  %v202_v31 = vadd.f32 %v277_v23, %v201_v29 }
  0xe4   :  { %v241_v32 = vmax.f32 %v167_v26, 0.0  ;;  %v249_v33 = vmax.f32 %v207_v27, 0.0 }
  0xe5   :  { %v240_v34 = vmax.f32 %v162_v30, 0.0  ;;  %v248_v35 = vmax.f32 %v202_v31, 0.0  ;;  %v331_v36 = vpop.f32.mrb[2].mxu0  ;;  %v343_v37 = vpop.f32.mrb[2].mxu1 }
  0xe6   :  { %258 = vst.msk [vmem:[%s533_s3 + $0x8] sm:$0xff] %vm256_vm2, %v241_v32  ;;  %266 = vst.msk [vmem:[%s533_s3 + $0x48] sm:$0xff] %vm256_vm2, %v249_v33  ;;  %v177_v38 = vadd.f32 %v331_v36, %v277_v23  ;;  %v217_v39 = vadd.f32 %v343_v37, %v277_v23  ;;  %v171_v40 = vpop.f32.mrb[3].mxu0  ;;  %v211_v41 = vpop.f32.mrb[3].mxu1 }
  0xe7   :  { %257 = vst.msk [vmem:[%s533_s3] sm:$0xff] %vm256_vm2, %v240_v34  ;;  %265 = vst.msk [vmem:[%s533_s3 + $0x40] sm:$0xff] %vm256_vm2, %v248_v35  ;;  %v172_v42 = vadd.f32 %v277_v23, %v171_v40  ;;  %v212_v43 = vadd.f32 %v277_v23, %v211_v41 }
  0xe8   :  { %v243_v44 = vmax.f32 %v177_v38, 0.0  ;;  %v251_v45 = vmax.f32 %v217_v39, 0.0 }
  0xe9   :  { %v242_v46 = vmax.f32 %v172_v42, 0.0  ;;  %v250_v47 = vmax.f32 %v212_v43, 0.0  ;;  %v334_v48 = vpop.f32.mrb[4].mxu0  ;;  %v346_v49 = vpop.f32.mrb[4].mxu1 }
  0xea   :  { %260 = vst.msk [vmem:[%s533_s3 + $0x18] sm:$0xff] %vm256_vm2, %v243_v44  ;;  %268 = vst.msk [vmem:[%s533_s3 + $0x58] sm:$0xff] %vm256_vm2, %v251_v45  ;;  %v187_v50 = vadd.f32 %v334_v48, %v277_v23  ;;  %v227_v51 = vadd.f32 %v346_v49, %v277_v23  ;;  %v181_v52 = vpop.f32.mrb[5].mxu0  ;;  %v221_v53 = vpop.f32.mrb[5].mxu1 }
  0xeb   :  { %259 = vst.msk [vmem:[%s533_s3 + $0x10] sm:$0xff] %vm256_vm2, %v242_v46  ;;  %267 = vst.msk [vmem:[%s533_s3 + $0x50] sm:$0xff] %vm256_vm2, %v250_v47  ;;  %v182_v54 = vadd.f32 %v277_v23, %v181_v52  ;;  %v222_v55 = vadd.f32 %v277_v23, %v221_v53 }
  0xec   :  { %v245_v56 = vmax.f32 %v187_v50, 0.0  ;;  %v253_v57 = vmax.f32 %v227_v51, 0.0 }
  0xed   :  { %v244_v58 = vmax.f32 %v182_v54, 0.0  ;;  %v252_v59 = vmax.f32 %v222_v55, 0.0  ;;  %v337_v60 = vpop.f32.mrb[6].mxu0  ;;  %v349_v61 = vpop.f32.mrb[6].mxu1 }
  0xee   :  { %262 = vst.msk [vmem:[%s533_s3 + $0x28] sm:$0xff] %vm256_vm2, %v245_v56  ;;  %270 = vst.msk [vmem:[%s533_s3 + $0x68] sm:$0xff] %vm256_vm2, %v253_v57  ;;  %v197_v62 = vadd.f32 %v337_v60, %v277_v23  ;;  %v237_v63 = vadd.f32 %v349_v61, %v277_v23  ;;  %v191_v0 = vpop.f32.mrb[7].mxu0  ;;  %v231_v1 = vpop.f32.mrb[7].mxu1 }
  0xef   :  { %261 = vst.msk [vmem:[%s533_s3 + $0x20] sm:$0xff] %vm256_vm2, %v244_v58  ;;  %269 = vst.msk [vmem:[%s533_s3 + $0x60] sm:$0xff] %vm256_vm2, %v252_v59  ;;  %v192_v2 = vadd.f32 %v277_v23, %v191_v0  ;;  %v232_v3 = vadd.f32 %v277_v23, %v231_v1 }
  0xf0   :  { %v247_v4 = vmax.f32 %v197_v62, 0.0  ;;  %v255_v5 = vmax.f32 %v237_v63, 0.0 }
  0xf1   :  { %v246_v6 = vmax.f32 %v192_v2, 0.0  ;;  %v254_v7 = vmax.f32 %v232_v3, 0.0 }
  0xf2   :  { %264 = vst.msk [vmem:[%s533_s3 + $0x38] sm:$0xff] %vm256_vm2, %v247_v4  ;;  %272 = vst.msk [vmem:[%s533_s3 + $0x78] sm:$0xff] %vm256_vm2, %v255_v5 }
  0xf3   :  { %263 = vst.msk [vmem:[%s533_s3 + $0x30] sm:$0xff] %vm256_vm2, %v246_v6  ;;  %271 = vst.msk [vmem:[%s533_s3 + $0x70] sm:$0xff] %vm256_vm2, %v254_v7 }

// kernel: cnn_critic_forward.4
= control target key start
LH: loop header
LB: loop body
LE: loop exit
PB: predicated region body
PF: predicated region fallthrough
CT: control target
= control target key end

     0   :  { %vm69_vm0 = vcmask 261120   ;;  %vm256_vm1 = vcmask 523264   ;;  %s563_s1 = inlined_call_operand.vmem [shape: f32[288,64], index: 1, kind: input, shape index: {}]   ;;  %s564_s0 = inlined_call_operand.vmem [shape: f32[32,288], index: 0, kind: input, shape index: {}]   ;;  %s565_s2 = inlined_call_operand.vmem [shape: f32[1,64], index: 2, kind: input, shape index: {}]   ;;  %s566_s3 = inlined_call_operand.vmem [shape: f32[32,64], index: 3, kind: output, shape index: {}]  }
   0x1   :  { %v42_v0 = vld [vmem:[%s563_s1 + $0x80] sm:$0xff]  ;;  %v43_v1 = vld [vmem:[%s563_s1 + $0x88] sm:$0xff]  ;;  %v44_v5 = vld [vmem:[%s563_s1 + $0x90] sm:$0xff] }
   0x2   :  { %v26_v2 = vld [vmem:[%s563_s1] sm:$0xff]  ;;  %v336_v3 = vpack.c.bf16 %v43_v1, %v42_v0  ;;  %v27_v4 = vld [vmem:[%s563_s1 + $0x8] sm:$0xff]  ;;  %v45_v6 = vld [vmem:[%s563_s1 + $0x98] sm:$0xff] }
   0x3   :  { %v338_v7 = vpack.c.bf16 %v27_v4, %v26_v2  ;;  %v340_v8 = vpack.c.bf16 %v45_v6, %v44_v5  ;;  %v28_v9 = vld [vmem:[%s563_s1 + $0x10] sm:$0xff]  ;;  %v29_v10 = vld [vmem:[%s563_s1 + $0x18] sm:$0xff]  ;;  %v46_v11 = vld [vmem:[%s563_s1 + $0xa0] sm:$0xff] }
   0x4   :  { %337 = vmatprep.subr.bf16.mxu0 %v336_v3  ;;  %v47_v12 = vld [vmem:[%s563_s1 + $0xa8] sm:$0xff]  ;;  %v342_v13 = vpack.c.bf16 %v29_v10, %v28_v9  ;;  %v30_v15 = vld [vmem:[%s563_s1 + $0x20] sm:$0xff]  ;;  %v48_v17 = vld [vmem:[%s563_s1 + $0xb0] sm:$0xff] }
   0x5   :  { %339 = vmatpush3.bf16.msra.mxu0 %v338_v7  ;;  %v344_v14 = vpack.c.bf16 %v47_v12, %v46_v11  ;;  %v31_v16 = vld [vmem:[%s563_s1 + $0x28] sm:$0xff]  ;;  %v49_v18 = vld [vmem:[%s563_s1 + $0xb8] sm:$0xff]  ;;  %v32_v21 = vld [vmem:[%s563_s1 + $0x30] sm:$0xff] }
   0x6   :  { %341 = vmatprep.subr.bf16.mxu0 %v340_v8  ;;  %v346_v19 = vpack.c.bf16 %v31_v16, %v30_v15  ;;  %v348_v20 = vpack.c.bf16 %v49_v18, %v48_v17  ;;  %v33_v22 = vld [vmem:[%s563_s1 + $0x38] sm:$0xff]  ;;  %v50_v23 = vld [vmem:[%s563_s1 + $0xc0] sm:$0xff]  ;;  %v51_v24 = vld [vmem:[%s563_s1 + $0xc8] sm:$0xff] }
   0x7   :  { %v58_v25 = vld [vmem:[%s563_s1 + $0x100] sm:$0xff]  ;;  %v59_v26 = vld [vmem:[%s563_s1 + $0x108] sm:$0xff]  ;;  %v350_v29 = vpack.c.bf16 %v33_v22, %v32_v21  ;;  %v60_v30 = vld [vmem:[%s563_s1 + $0x110] sm:$0xff]  ;;  %v352_v32 = vpack.c.bf16 %v51_v24, %v50_v23 }
   0x8   :  { %v368_v27 = vpack.c.bf16 %v59_v26, %v58_v25  ;;  %v15_v28 = vld [vmem:[%s564_s0 + $0x8] sm:$0xff]  ;;  %v61_v31 = vld [vmem:[%s563_s1 + $0x118] sm:$0xff]  ;;  %v34_v33 = vld [vmem:[%s563_s1 + $0x40] sm:$0xff] }
   0x9   :  { %343 = vmatpush3.bf16.msra.mxu0 %v342_v13  ;;  %146 = vmatprep.mubr.f32.mxu0 %v15_v28  ;;  %v35_v34 = vld [vmem:[%s563_s1 + $0x48] sm:$0xff]  ;;  %v372_v35 = vpack.c.bf16 %v61_v31, %v60_v30  ;;  %v16_v36 = vld [vmem:[%s564_s0 + $0x10] sm:$0xff]  ;;  %v53_v38 = vld [vmem:[%s563_s1 + $0xd8] sm:$0xff] }
   0xa   :  { %345 = vmatprep.subr.bf16.mxu0 %v344_v14  ;;  %369 = vmatprep.subr.bf16.mxu1 %v368_v27  ;;  %v52_v37 = vld [vmem:[%s563_s1 + $0xd0] sm:$0xff]  ;;  %v354_v39 = vpack.c.bf16 %v35_v34, %v34_v33  ;;  %v37_v42 = vld [vmem:[%s563_s1 + $0x58] sm:$0xff]  ;;  %v54_v43 = vld [vmem:[%s563_s1 + $0xe0] sm:$0xff] }
   0xb   :  { %371 = vmatpush3.bf16.msra.mxu1 %v368_v27  ;;  %330 = vmatprep.mubr.msk.f32.mxu1 %vm69_vm0, %v16_v36  ;;  %v356_v40 = vpack.c.bf16 %v53_v38, %v52_v37  ;;  %v36_v41 = vld [vmem:[%s563_s1 + $0x50] sm:$0xff]  ;;  %v55_v44 = vld [vmem:[%s563_s1 + $0xe8] sm:$0xff]  ;;  %v22_v46 = vld [vmem:[%s564_s0 + $0x40] sm:$0xff] }
   0xc   :  { %373 = vmatprep.subr.bf16.mxu1 %v372_v35  ;;  %v19_v45 = vld [vmem:[%s564_s0 + $0x28] sm:$0xff]  ;;  %v358_v47 = vpack.c.bf16 %v37_v42, %v36_v41  ;;  %v360_v48 = vpack.c.bf16 %v55_v44, %v54_v43  ;;  %v38_v49 = vld [vmem:[%s563_s1 + $0x60] sm:$0xff]  ;;  %v56_v51 = vld [vmem:[%s563_s1 + $0xf0] sm:$0xff] }
   0xd   :  { %347 = vmatpush3.bf16.msra.mxu0 %v346_v19  ;;  %v39_v50 = vld [vmem:[%s563_s1 + $0x68] sm:$0xff]  ;;  %v57_v52 = vld [vmem:[%s563_s1 + $0xf8] sm:$0xff]  ;;  %v40_v56 = vld [vmem:[%s563_s1 + $0x70] sm:$0xff] }
   0xe   :  { %349 = vmatprep.subr.bf16.mxu0 %v348_v20  ;;  %v25_v53 = vld [vmem:[%s564_s0 + $0x58] sm:$0xff]  ;;  %v362_v54 = vpack.c.bf16 %v39_v50, %v38_v49  ;;  %v364_v55 = vpack.c.bf16 %v57_v52, %v56_v51  ;;  %v14_v59 = vld [vmem:[%s564_s0] sm:$0xff]  ;;  %v20_v63 = vld [vmem:[%s564_s0 + $0x30] sm:$0xff] }
   0xf   :  { %375 = vmatpush3.bf16.msra.mxu1 %v372_v35  ;;  %v41_v57 = vld [vmem:[%s563_s1 + $0x78] sm:$0xff]  ;;  %v18_v60 = vld [vmem:[%s564_s0 + $0x20] sm:$0xff]  ;;  %v24_v0 = vld [vmem:[%s564_s0 + $0x50] sm:$0xff] }
  0x10   :  { %v366_v58 = vpack.c.bf16 %v41_v57, %v40_v56  ;;  %v17_v61 = vld [vmem:[%s564_s0 + $0x18] sm:$0xff]  ;;  %v23_v1 = vld [vmem:[%s564_s0 + $0x48] sm:$0xff]  ;;  %v265_v8 = vld [vmem:[%s565_s2] ss:$0 sm:$0xff] }
  0x11   :  { %351 = vmatpush3.bf16.msra.mxu0 %v350_v29  ;;  %v21_v62 = vld [vmem:[%s564_s0 + $0x38] sm:$0xff] }
  0x12   :  { %353 = vmatprep.subr.bf16.mxu0 %v352_v32  ;;  %331 = vmatmul.mubr.msk.f32.vlgmr.msra.gmra.mrb[0].mxu1 %vm69_vm0, %v19_v45 }
  0x13   :  { %333 = vmatprep.mubr.msk.f32.mxu1 %vm69_vm0, %v22_v46 }
  0x15   :  { %355 = vmatpush3.bf16.msra.mxu0 %v354_v39 }
  0x16   :  { %357 = vmatprep.subr.bf16.mxu0 %v356_v40  ;;  %334 = vmatmul.mubr.msk.f32.gmra.mrb[2].mxu1 %vm69_vm0, %v25_v53 }
  0x19   :  { %359 = vmatpush3.bf16.msra.mxu0 %v358_v47 }
  0x1a   :  { %361 = vmatprep.subr.bf16.mxu0 %v360_v48 }
  0x1d   :  { %363 = vmatpush3.bf16.msra.mxu0 %v362_v54 }
  0x1e   :  { %365 = vmatprep.subr.bf16.mxu0 %v364_v55 }
  0x21   :  { %367 = vmatpush3.bf16.msra.mxu0 %v366_v58 }
  0x24   :  { %147 = vmatmul.mubr.f32.vlgmr.msra.gmra.mrb[0].mxu0 %v14_v59 }
  0x25   :  { %151 = vmatprep.mubr.f32.mxu0 %v18_v60 }
  0x28   :  { %152 = vmatmul.mubr.f32.gmra.mrb[2].mxu0 %v17_v61 }
  0x29   :  { %156 = vmatprep.mubr.f32.mxu0 %v21_v62 }
  0x2c   :  { %157 = vmatmul.mubr.f32.gmra.mrb[4].mxu0 %v20_v63 }
  0x2d   :  { %161 = vmatprep.mubr.f32.mxu0 %v24_v0 }
  0x30   :  { %162 = vmatmul.mubr.f32.gmra.mrb[6].mxu0 %v23_v1 }
  0xe5   :  { %v332_v2 = vpop.f32.mrb[0].mxu1 }
  0xe6   :  { %v233_v3 = vpop.f32.mrb[1].mxu1 }
  0xe9   :  { %v335_v4 = vpop.f32.mrb[2].mxu1 }
  0xea   :  { %v243_v5 = vpop.f32.mrb[3].mxu1 }
  0xf7   :  { %v302_v6 = vpop.f32.mrb[0].mxu0 }
  0xf8   :  { %v303_v7 = vpop.f32.mrb[1].mxu0 }
  0xf9   :  { %v304_v9 = vadd.f32 %v303_v7, %v302_v6 }
  0xfb   :  { %v305_v10 = vpop.f32.mrb[2].mxu0  ;;  %v149_v11 = vadd.f32 %v304_v9, %v265_v8 }
  0xfc   :  { %v306_v12 = vpop.f32.mrb[3].mxu0 }
  0xfd   :  { %v307_v13 = vadd.f32 %v306_v12, %v305_v10  ;;  %v234_v14 = vadd.f32 %v233_v3, %v149_v11 }
  0xff   :  { %v154_v15 = vadd.f32 %v307_v13, %v265_v8  ;;  %v252_v16 = vmax.f32 %v234_v14, 0.0  ;;  %v308_v17 = vpop.f32.mrb[4].mxu0 }
 0x100   :  { %v309_v18 = vpop.f32.mrb[5].mxu0 }
 0x101   :  { %v239_v19 = vadd.f32 %v332_v2, %v154_v15  ;;  %257 = vst.msk [vmem:[%s566_s3] sm:$0xff] %vm256_vm1, %v252_v16  ;;  %v310_v20 = vadd.f32 %v309_v18, %v308_v17 }
 0x103   :  { %v253_v21 = vmax.f32 %v239_v19, 0.0  ;;  %v311_v22 = vpop.f32.mrb[6].mxu0  ;;  %v159_v23 = vadd.f32 %v310_v20, %v265_v8 }
 0x104   :  { %v312_v24 = vpop.f32.mrb[7].mxu0 }
 0x105   :  { %258 = vst.msk [vmem:[%s566_s3 + $0x8] sm:$0xff] %vm256_vm1, %v253_v21  ;;  %v313_v25 = vadd.f32 %v312_v24, %v311_v22  ;;  %v244_v26 = vadd.f32 %v243_v5, %v159_v23 }
 0x107   :  { %v164_v27 = vadd.f32 %v313_v25, %v265_v8  ;;  %v254_v28 = vmax.f32 %v244_v26, 0.0 }
 0x109   :  { %v249_v29 = vadd.f32 %v335_v4, %v164_v27  ;;  %259 = vst.msk [vmem:[%s566_s3 + $0x10] sm:$0xff] %vm256_vm1, %v254_v28 }
 0x10b   :  { %v255_v30 = vmax.f32 %v249_v29, 0.0 }
 0x10d   :  { %260 = vst.msk [vmem:[%s566_s3 + $0x18] sm:$0xff] %vm256_vm1, %v255_v30 }

// kernel: cnn_critic_forward.5
= control target key start
LH: loop header
LB: loop body
LE: loop exit
PB: predicated region body
PF: predicated region fallthrough
CT: control target
= control target key end

     0   :  { %vm57_vm0 = vcmask 1045504   ;;  %vm53_vm1 = vcmask 48128   ;;  %v1400_v0 = vmov 0.0   ;;  %vm1401_vm2 = vmmov 0   ;;  %s2041_s2 = inlined_call_operand.vmem [shape: f32[6,64], index: 2, kind: input, shape index: {}]   ;;  %s2042_s1 = inlined_call_operand.vmem [shape: f32[2,6], index: 1, kind: input, shape index: {}]   ;;  %s2043_s4 = inlined_call_operand.vmem [shape: f32[64,64], index: 4, kind: input, shape index: {}]   ;;  %s2044_s6 = inlined_call_operand.vmem [shape: f32[1024,64], index: 6, kind: input, shape index: {}]   ;;  %s2045_s7 = inlined_call_operand.vmem [shape: f32[64,64], index: 7, kind: input, shape index: {}]   ;;  %s2046_s3 = inlined_call_operand.vmem [shape: f32[1,64], index: 3, kind: input, shape index: {}]   ;;  %s2047_s0 = inlined_call_operand.vmem [shape: f32[2,1024], index: 0, kind: input, shape index: {}]   ;;  %s2048_s5 = inlined_call_operand.vmem [shape: f32[1,64], index: 5, kind: input, shape index: {}]   ;;  %s2049_s9 = inlined_call_operand.vmem [shape: f32[1,64,64], index: 9, kind: input, shape index: {}]   ;;  %s2050_s11 = inlined_call_operand.vmem [shape: f32[64,128], index: 11, kind: input, shape index: {}]   ;;  %s2051_s8 = inlined_call_operand.vmem [shape: f32[1,64], index: 8, kind: input, shape index: {}]   ;;  %s2052_s10 = inlined_call_operand.vmem [shape: f32[1,1,64], index: 10, kind: input, shape index: {}]   ;;  %s2053_s12 = inlined_call_operand.vmem [shape: f32[1,128], index: 12, kind: input, shape index: {}]   ;;  %s2054_s13 = inlined_call_operand.vmem [shape: f32[2,128], index: 13, kind: output, shape index: {}]  }
   0x1   :  { %1137 = vmatprep.subr.mxu0 %v1400_v0  ;;  %v45_v1 = vld [vmem:[%s2041_s2] sm:$0x3f]  ;;  %1139 = vmatprep.mubr.msk.f32.mxu0 %vm1401_vm2, %v1400_v0  ;;  %v1402_v4 = vmov 0.0|0.0   ;;  %v133_v5 = vld [vmem:[%s2043_s4 + $0x8] sm:$0xff]  ;;  %v134_v6 = vld [vmem:[%s2043_s4 + $0x10] sm:$0xff]  ;;  %vm147_vm3 = vcmask 523264  }
   0x2   :  { %v44_v2 = vld [vmem:[%s2042_s1] sm:$0x3]  ;;  %1138 = vmatpush3.msk.msra.mxu0 %vm57_vm0, %v45_v1  ;;  %1218 = vmatprep.subr.bf16.mxu1 %v1402_v4  ;;  %v135_v7 = vld [vmem:[%s2043_s4 + $0x18] sm:$0xff]  ;;  %v137_v11 = vld [vmem:[%s2043_s4 + $0x28] sm:$0xff] }
   0x3   :  { %v132_v3 = vld [vmem:[%s2043_s4] sm:$0xff]  ;;  %1140 = vmatmul.mubr.msk.f32.vlgmr.msra.gmra.mrb[0].mxu0 %vm53_vm1, %v44_v2  ;;  %1158 = vmatprep.mubr.msk.f32.mxu1 %vm1401_vm2, %v1400_v0  ;;  %v1222_v9 = vpack.c.bf16 %v135_v7, %v134_v6  ;;  %v138_v13 = vld [vmem:[%s2043_s4 + $0x30] sm:$0xff]  ;;  %v139_v14 = vld [vmem:[%s2043_s4 + $0x38] sm:$0xff] }
   0x4   :  { %v1219_v8 = vpack.c.bf16 %v133_v5, %v132_v3  ;;  %1230 = vmatprep.subr.bf16.mxu0 %v1402_v4  ;;  %1177 = vmatprep.mubr.msk.f32.mxu0 %vm1401_vm2, %v1400_v0  ;;  %v136_v10 = vld [vmem:[%s2043_s4 + $0x20] sm:$0xff]  ;;  %v1228_v15 = vpack.c.bf16 %v139_v14, %v138_v13  ;;  %v241_v17 = vld [vmem:[%s2044_s6 + $0x88] sm:$0xff]  ;;  %v354_v22 = vld [vmem:[%s2045_s7 + $0x10] sm:$0xff] }
   0x5   :  { %v1225_v12 = vpack.c.bf16 %v137_v11, %v136_v10  ;;  %v240_v16 = vld [vmem:[%s2044_s6 + $0x80] sm:$0xff]  ;;  %v353_v20 = vld [vmem:[%s2045_s7 + $0x8] sm:$0xff]  ;;  %v355_v23 = vld [vmem:[%s2045_s7 + $0x18] sm:$0xff] }
   0x6   :  { %1220 = vmatpush3.bf16.msra.mxu1 %v1219_v8  ;;  %v1242_v18 = vpack.c.bf16 %v241_v17, %v240_v16  ;;  %v352_v19 = vld [vmem:[%s2045_s7] sm:$0xff]  ;;  %v1234_v24 = vpack.c.bf16 %v355_v23, %v354_v22  ;;  %v357_v26 = vld [vmem:[%s2045_s7 + $0x28] sm:$0xff]  ;;  %v242_v32 = vld [vmem:[%s2044_s6 + $0x90] sm:$0xff]  ;;  %v1403_v16 = vmov 1983009808  }
   0x7   :  { %1221 = vmatprep.subr.bf16.mxu1 %v1402_v4  ;;  %v1231_v21 = vpack.c.bf16 %v353_v20, %v352_v19  ;;  %v356_v25 = vld [vmem:[%s2045_s7 + $0x20] sm:$0xff]  ;;  %v225_v30 = vld [vmem:[%s2044_s6 + $0x8] sm:$0xff]  ;;  %v243_v33 = vld [vmem:[%s2044_s6 + $0x98] sm:$0xff]  ;;  %v437_v17 = vunpack.c.l.s4 %v1403_v16 }
   0x8   :  { %v1237_v27 = vpack.c.bf16 %v357_v26, %v356_v25  ;;  %v948_v28 = vld [vmem:[%s2046_s3] ss:$0 sm:$0xff]  ;;  %v1246_v38 = vpack.c.bf16 %v243_v33, %v242_v32  ;;  %v226_v39 = vld [vmem:[%s2044_s6 + $0x10] sm:$0xff]  ;;  %v227_v40 = vld [vmem:[%s2044_s6 + $0x18] sm:$0xff] }
   0x9   :  { %1232 = vmatpush3.bf16.msra.mxu0 %v1231_v21  ;;  %v224_v29 = vld [vmem:[%s2044_s6] sm:$0xff]  ;;  %v245_v42 = vld [vmem:[%s2044_s6 + $0xa8] sm:$0xff]  ;;  %v1248_v43 = vpack.c.bf16 %v227_v40, %v226_v39  ;;  %v246_v47 = vld [vmem:[%s2044_s6 + $0xb0] sm:$0xff]  ;;  %v438_v19 = vunpack.c.0.s8 %v437_v17 }
   0xa   :  { %1223 = vmatpush3.bf16.msra.mxu1 %v1222_v9  ;;  %1233 = vmatprep.subr.bf16.mxu0 %v1402_v4  ;;  %v1244_v36 = vpack.c.bf16 %v225_v30, %v224_v29  ;;  %v244_v41 = vld [vmem:[%s2044_s6 + $0xa0] sm:$0xff]  ;;  %v229_v46 = vld [vmem:[%s2044_s6 + $0x28] sm:$0xff]  ;;  %v247_v48 = vld [vmem:[%s2044_s6 + $0xb8] sm:$0xff] }
   0xb   :  { %1224 = vmatprep.subr.bf16.mxu1 %v1402_v4  ;;  %v1250_v44 = vpack.c.bf16 %v245_v42, %v244_v41  ;;  %v228_v45 = vld [vmem:[%s2044_s6 + $0x20] sm:$0xff]  ;;  %v1254_v50 = vpack.c.bf16 %v247_v48, %v246_v47  ;;  %v230_v51 = vld [vmem:[%s2044_s6 + $0x30] sm:$0xff]  ;;  %v231_v52 = vld [vmem:[%s2044_s6 + $0x38] sm:$0xff] }
   0xc   :  { %v1252_v49 = vpack.c.bf16 %v229_v46, %v228_v45  ;;  %v248_v53 = vld [vmem:[%s2044_s6 + $0xc0] sm:$0xff]  ;;  %v249_v54 = vld [vmem:[%s2044_s6 + $0xc8] sm:$0xff]  ;;  %v1256_v55 = vpack.c.bf16 %v231_v52, %v230_v51  ;;  %v250_v59 = vld [vmem:[%s2044_s6 + $0xd0] sm:$0xff] }
   0xd   :  { %1235 = vmatpush3.bf16.msra.mxu0 %v1234_v24  ;;  %v1258_v56 = vpack.c.bf16 %v249_v54, %v248_v53  ;;  %v232_v57 = vld [vmem:[%s2044_s6 + $0x40] sm:$0xff]  ;;  %v233_v58 = vld [vmem:[%s2044_s6 + $0x48] sm:$0xff]  ;;  %v251_v60 = vld [vmem:[%s2044_s6 + $0xd8] sm:$0xff] }
   0xe   :  { %1226 = vmatpush3.bf16.msra.mxu1 %v1225_v12  ;;  %1236 = vmatprep.subr.bf16.mxu0 %v1402_v4  ;;  %v1260_v61 = vpack.c.bf16 %v233_v58, %v232_v57  ;;  %v1262_v62 = vpack.c.bf16 %v251_v60, %v250_v59  ;;  %v234_v63 = vld [vmem:[%s2044_s6 + $0x50] sm:$0xff]  ;;  %v235_v1 = vld [vmem:[%s2044_s6 + $0x58] sm:$0xff]  ;;  %v252_v2 = vld [vmem:[%s2044_s6 + $0xe0] sm:$0xff] }
   0xf   :  { %1227 = vmatprep.subr.bf16.mxu1 %v1402_v4  ;;  %v253_v3 = vld [vmem:[%s2044_s6 + $0xe8] sm:$0xff]  ;;  %v1264_v5 = vpack.c.bf16 %v235_v1, %v234_v63  ;;  %v236_v7 = vld [vmem:[%s2044_s6 + $0x60] sm:$0xff]  ;;  %v254_v9 = vld [vmem:[%s2044_s6 + $0xf0] sm:$0xff] }
  0x10   :  { %v1266_v6 = vpack.c.bf16 %v253_v3, %v252_v2  ;;  %v237_v8 = vld [vmem:[%s2044_s6 + $0x68] sm:$0xff]  ;;  %v255_v10 = vld [vmem:[%s2044_s6 + $0xf8] sm:$0xff]  ;;  %v238_v13 = vld [vmem:[%s2044_s6 + $0x70] sm:$0xff] }
  0x11   :  { %1238 = vmatpush3.bf16.msra.mxu0 %v1237_v27  ;;  %v1268_v11 = vpack.c.bf16 %v237_v8, %v236_v7  ;;  %v1270_v12 = vpack.c.bf16 %v255_v10, %v254_v9  ;;  %v239_v14 = vld [vmem:[%s2044_s6 + $0x78] sm:$0xff]  ;;  %v1642_v22 = vld [vmem:[%s2047_s0] sm:$0xff]  ;;  %v358_v24 = vld [vmem:[%s2045_s7 + $0x30] sm:$0xff] }
  0x12   :  { %1229 = vmatpush3.bf16.msra.mxu1 %v1228_v15  ;;  %1239 = vmatprep.subr.bf16.mxu0 %v1402_v4  ;;  %v1272_v15 = vpack.c.bf16 %v239_v14, %v238_v13  ;;  %v359_v25 = vld [vmem:[%s2045_s7 + $0x38] sm:$0xff]  ;;  %v273_v29 = vld [vmem:[%s2044_s6 + $0x188] sm:$0xff]  ;;  %v290_v40 = vld [vmem:[%s2044_s6 + $0x210] sm:$0xff] }
  0x13   :  { %1243 = vmatprep.subr.bf16.mxu1 %v1242_v18  ;;  %v439_v18 = vlaneseq  ;;  %v1240_v26 = vpack.c.bf16 %v359_v25, %v358_v24  ;;  %v305_v32 = vld [vmem:[%s2044_s6 + $0x288] sm:$0xff]  ;;  %v291_v41 = vld [vmem:[%s2044_s6 + $0x218] sm:$0xff]  ;;  %v292_v46 = vld [vmem:[%s2044_s6 + $0x220] sm:$0xff] }
  0x14   :  { %v1312_v42 = vpack.c.bf16 %v291_v41, %v290_v40  ;;  %v293_v47 = vld [vmem:[%s2044_s6 + $0x228] sm:$0xff]  ;;  %v294_v52 = vld [vmem:[%s2044_s6 + $0x230] sm:$0xff]  ;;  %v295_v53 = vld [vmem:[%s2044_s6 + $0x238] sm:$0xff] }
  0x15   :  { %v440_v20 = vshrl.u32 %v439_v18, 7  ;;  %1241 = vmatpush3.bf16.msra.mxu0 %v1240_v26  ;;  %v1316_v48 = vpack.c.bf16 %v293_v47, %v292_v46  ;;  %v1320_v54 = vpack.c.bf16 %v295_v53, %v294_v52  ;;  %v296_v58 = vld [vmem:[%s2044_s6 + $0x240] sm:$0xff]  ;;  %v297_v59 = vld [vmem:[%s2044_s6 + $0x248] sm:$0xff]  ;;  %v298_v1 = vld [vmem:[%s2044_s6 + $0x250] sm:$0xff] }
  0x16   :  { %v1324_v60 = vpack.c.bf16 %v297_v59, %v296_v58  ;;  %v299_v2 = vld [vmem:[%s2044_s6 + $0x258] sm:$0xff]  ;;  %v300_v8 = vld [vmem:[%s2044_s6 + $0x260] sm:$0xff]  ;;  %v301_v9 = vld [vmem:[%s2044_s6 + $0x268] sm:$0xff] }
  0x17   :  { %v1637_v21 = vsub.s32 %v438_v19, %v440_v20  ;;  %v1328_v3 = vpack.c.bf16 %v299_v2, %v298_v1  ;;  %v1332_v10 = vpack.c.bf16 %v301_v9, %v300_v8  ;;  %v302_v14 = vld [vmem:[%s2044_s6 + $0x270] sm:$0xff]  ;;  %v1757_v16 = vld [vmem:[%s2047_s0 + $0x8] sm:$0xff]  ;;  %v435_v20 = vcombine.high %v1642_v22, %v1642_v22  ;;  %v256_v25 = vld [vmem:[%s2044_s6 + $0x100] sm:$0xff] }
  0x18   :  { %v257_v26 = vld [vmem:[%s2044_s6 + $0x108] sm:$0xff]  ;;  %v260_v41 = vld [vmem:[%s2044_s6 + $0x120] sm:$0xff]  ;;  %v262_v47 = vld [vmem:[%s2044_s6 + $0x130] sm:$0xff]  ;;  %v452_v8 = vcombine.high %v1757_v16, %v1757_v16 }
  0x19   :  { %v442_v23 = vrot.slane %v1642_v22, %v1637_v21  ;;  %v459_v18 = vrot.slane %v1757_v16, %v1637_v21  ;;  %v1770_v24 = vrot.slane %v435_v20, %v1637_v21  ;;  %v274_v22 = vld [vmem:[%s2044_s6 + $0x190] sm:$0xff]  ;;  %v264_v53 = vld [vmem:[%s2044_s6 + $0x140] sm:$0xff]  ;;  %v339_v20 = vld [vmem:[%s2044_s6 + $0x398] sm:$0xff] }
  0x1a   :  { %v266_v59 = vld [vmem:[%s2044_s6 + $0x150] sm:$0xff]  ;;  %v268_v2 = vld [vmem:[%s2044_s6 + $0x160] sm:$0xff] }
  0x1b   :  { %v450_v27 = vcombine.high %v442_v23, %v442_v23  ;;  %v467_v19 = vcombine.high %v459_v18, %v459_v18 }
  0xd6   :  { %v127_v31 = vpop.f32.mrb[0].mxu0 }
  0xd7   :  { %v128_v34 = vadd.f32 %v948_v28, %v127_v31  ;;  %v1141_v35 = vpop.f32.mrb[1].mxu0  ;;  %v272_v28 = vld [vmem:[%s2044_s6 + $0x180] sm:$0xff] }
  0xd8   :  { %v1274_v30 = vpack.c.bf16 %v273_v29, %v272_v28  ;;  %v304_v31 = vld [vmem:[%s2044_s6 + $0x280] sm:$0xff]  ;;  %v289_v35 = vld [vmem:[%s2044_s6 + $0x208] sm:$0xff]  ;;  %v275_v28 = vld [vmem:[%s2044_s6 + $0x198] sm:$0xff] }
  0xd9   :  { %v131_v37 = vmax.f32 %v128_v34, 0.0  ;;  %v1306_v33 = vpack.c.bf16 %v305_v32, %v304_v31  ;;  %v288_v34 = vld [vmem:[%s2044_s6 + $0x200] sm:$0xff]  ;;  %v1276_v31 = vpack.c.bf16 %v257_v26, %v256_v25  ;;  %v451_v32 = vcombine.high %v1770_v24, %v1770_v24  ;;  %v322_v26 = vld [vmem:[%s2044_s6 + $0x310] sm:$0xff] }
  0xda   :  { %1275 = vmatprep.subr.bf16.mxu0 %v1274_v30 }
  0xdb   :  { %1159 = vmatmul.mubr.msk.f32.vlgmr.msra.gmra.mrb[0].mxu1 %vm147_vm3, %v131_v37  ;;  %v306_v37 = vld [vmem:[%s2044_s6 + $0x290] sm:$0xff] }
  0xdc   :  { %1245 = vmatpush3.bf16.msra.mxu1 %v1244_v36  ;;  %541 = vmatprep.mubr.f32.mxu1 %v450_v27  ;;  %v1308_v36 = vpack.c.bf16 %v289_v35, %v288_v34  ;;  %v1278_v34 = vpack.c.bf16 %v275_v28, %v274_v22  ;;  %v258_v35 = vld [vmem:[%s2044_s6 + $0x110] sm:$0xff]  ;;  %v340_v22 = vld [vmem:[%s2044_s6 + $0x3a0] sm:$0xff]  ;;  %v341_v28 = vld [vmem:[%s2044_s6 + $0x3a8] sm:$0xff] }
  0xdd   :  { %1247 = vmatprep.subr.bf16.mxu1 %v1246_v38  ;;  %v307_v38 = vld [vmem:[%s2044_s6 + $0x298] sm:$0xff] }
  0xde   :  { %v1310_v39 = vpack.c.bf16 %v307_v38, %v306_v37  ;;  %v276_v37 = vld [vmem:[%s2044_s6 + $0x1a0] sm:$0xff]  ;;  %v277_v38 = vld [vmem:[%s2044_s6 + $0x1a8] sm:$0xff] }
  0xdf   :  { %v1282_v40 = vpack.c.bf16 %v277_v38, %v276_v37  ;;  %v327_v37 = vld [vmem:[%s2044_s6 + $0x338] sm:$0xff]  ;;  %v344_v38 = vld [vmem:[%s2044_s6 + $0x3c0] sm:$0xff] }
  0xe0   :  { %1249 = vmatpush3.bf16.msra.mxu1 %v1248_v43  ;;  %v308_v43 = vld [vmem:[%s2044_s6 + $0x2a0] sm:$0xff] }
  0xe1   :  { %1251 = vmatprep.subr.bf16.mxu1 %v1250_v44  ;;  %v309_v44 = vld [vmem:[%s2044_s6 + $0x2a8] sm:$0xff] }
  0xe2   :  { %v1314_v45 = vpack.c.bf16 %v309_v44, %v308_v43  ;;  %v278_v43 = vld [vmem:[%s2044_s6 + $0x1b0] sm:$0xff]  ;;  %v279_v44 = vld [vmem:[%s2044_s6 + $0x1b8] sm:$0xff] }
  0xe3   :  { %v1286_v46 = vpack.c.bf16 %v279_v44, %v278_v43  ;;  %v329_v43 = vld [vmem:[%s2044_s6 + $0x348] sm:$0xff]  ;;  %v346_v44 = vld [vmem:[%s2044_s6 + $0x3d0] sm:$0xff] }
  0xe4   :  { %1253 = vmatpush3.bf16.msra.mxu1 %v1252_v49  ;;  %v310_v49 = vld [vmem:[%s2044_s6 + $0x2b0] sm:$0xff] }
  0xe5   :  { %1255 = vmatprep.subr.bf16.mxu1 %v1254_v50  ;;  %v311_v50 = vld [vmem:[%s2044_s6 + $0x2b8] sm:$0xff] }
  0xe6   :  { %v1318_v51 = vpack.c.bf16 %v311_v50, %v310_v49  ;;  %v280_v49 = vld [vmem:[%s2044_s6 + $0x1c0] sm:$0xff]  ;;  %v281_v50 = vld [vmem:[%s2044_s6 + $0x1c8] sm:$0xff] }
  0xe7   :  { %v1290_v52 = vpack.c.bf16 %v281_v50, %v280_v49  ;;  %v331_v49 = vld [vmem:[%s2044_s6 + $0x358] sm:$0xff]  ;;  %v348_v50 = vld [vmem:[%s2044_s6 + $0x3e0] sm:$0xff] }
  0xe8   :  { %1257 = vmatpush3.bf16.msra.mxu1 %v1256_v55  ;;  %v312_v55 = vld [vmem:[%s2044_s6 + $0x2c0] sm:$0xff] }
  0xe9   :  { %1259 = vmatprep.subr.bf16.mxu1 %v1258_v56  ;;  %v313_v56 = vld [vmem:[%s2044_s6 + $0x2c8] sm:$0xff] }
  0xea   :  { %v1322_v57 = vpack.c.bf16 %v313_v56, %v312_v55  ;;  %v282_v55 = vld [vmem:[%s2044_s6 + $0x1d0] sm:$0xff]  ;;  %v283_v56 = vld [vmem:[%s2044_s6 + $0x1d8] sm:$0xff] }
  0xeb   :  { %v1294_v58 = vpack.c.bf16 %v283_v56, %v282_v55  ;;  %v333_v55 = vld [vmem:[%s2044_s6 + $0x368] sm:$0xff]  ;;  %v350_v56 = vld [vmem:[%s2044_s6 + $0x3f0] sm:$0xff] }
  0xec   :  { %1261 = vmatpush3.bf16.msra.mxu1 %v1260_v61  ;;  %v314_v61 = vld [vmem:[%s2044_s6 + $0x2d0] sm:$0xff] }
  0xed   :  { %1263 = vmatprep.subr.bf16.mxu1 %v1262_v62  ;;  %v315_v62 = vld [vmem:[%s2044_s6 + $0x2d8] sm:$0xff] }
  0xee   :  { %v1326_v63 = vpack.c.bf16 %v315_v62, %v314_v61  ;;  %v284_v61 = vld [vmem:[%s2044_s6 + $0x1e0] sm:$0xff]  ;;  %v285_v62 = vld [vmem:[%s2044_s6 + $0x1e8] sm:$0xff] }
  0xef   :  { %v1298_v1 = vpack.c.bf16 %v285_v62, %v284_v61  ;;  %v335_v61 = vld [vmem:[%s2044_s6 + $0x378] sm:$0xff] }
  0xf0   :  { %1265 = vmatpush3.bf16.msra.mxu1 %v1264_v5  ;;  %v316_v5 = vld [vmem:[%s2044_s6 + $0x2e0] sm:$0xff] }
  0xf1   :  { %1267 = vmatprep.subr.bf16.mxu1 %v1266_v6  ;;  %v317_v6 = vld [vmem:[%s2044_s6 + $0x2e8] sm:$0xff] }
  0xf2   :  { %v1330_v7 = vpack.c.bf16 %v317_v6, %v316_v5  ;;  %v286_v5 = vld [vmem:[%s2044_s6 + $0x1f0] sm:$0xff]  ;;  %v287_v6 = vld [vmem:[%s2044_s6 + $0x1f8] sm:$0xff] }
  0xf3   :  { %v1302_v9 = vpack.c.bf16 %v287_v6, %v286_v5 }
  0xf4   :  { %1269 = vmatpush3.bf16.msra.mxu1 %v1268_v11  ;;  %v318_v11 = vld [vmem:[%s2044_s6 + $0x2f0] sm:$0xff] }
  0xf5   :  { %1271 = vmatprep.subr.bf16.mxu1 %v1270_v12  ;;  %v319_v12 = vld [vmem:[%s2044_s6 + $0x2f8] sm:$0xff] }
  0xf6   :  { %v1334_v13 = vpack.c.bf16 %v319_v12, %v318_v11  ;;  %v271_v11 = vld [vmem:[%s2044_s6 + $0x178] sm:$0xff]  ;;  %v336_v12 = vld [vmem:[%s2044_s6 + $0x380] sm:$0xff] }
  0xf8   :  { %1273 = vmatpush3.bf16.msra.mxu1 %v1272_v15  ;;  %v303_v15 = vld [vmem:[%s2044_s6 + $0x278] sm:$0xff] }
  0xf9   :  { %1307 = vmatprep.subr.bf16.mxu1 %v1306_v33  ;;  %v1336_v17 = vpack.c.bf16 %v303_v15, %v302_v14  ;;  %v1874_v15 = vrot.slane %v452_v8, %v1637_v21  ;;  %v767_v8 = vld [vmem:[%s2049_s9 + $0x8] sm:$0xff] }
  0xfb   :  { %542 = vmatmul.mubr.f32.vlgmr.msra.gmra.mrb[2].mxu1 %v442_v23  ;;  %v951_v23 = vld [vmem:[%s2048_s5] ss:$0 sm:$0xff] }
  0xfc   :  { %1309 = vmatpush3.bf16.msra.mxu1 %v1308_v36  ;;  %681 = vmatprep.mubr.f32.mxu1 %v467_v19  ;;  %v259_v36 = vld [vmem:[%s2044_s6 + $0x118] sm:$0xff]  ;;  %v338_v19 = vld [vmem:[%s2044_s6 + $0x390] sm:$0xff] }
  0xfd   :  { %1311 = vmatprep.subr.bf16.mxu1 %v1310_v39  ;;  %v1280_v39 = vpack.c.bf16 %v259_v36, %v258_v35  ;;  %v1342_v25 = vpack.c.bf16 %v339_v20, %v338_v19  ;;  %v326_v36 = vld [vmem:[%s2044_s6 + $0x330] sm:$0xff]  ;;  %v856_v19 = vld [vmem:[%s2050_s11 + $0x8] sm:$0xff] }
  0xfe   :  { %v857_v20 = vld [vmem:[%s2050_s11 + $0x10] sm:$0xff] }
 0x100   :  { %1313 = vmatpush3.bf16.msra.mxu1 %v1312_v42  ;;  %v261_v42 = vld [vmem:[%s2044_s6 + $0x128] sm:$0xff] }
 0x101   :  { %1315 = vmatprep.subr.bf16.mxu1 %v1314_v45  ;;  %v1284_v45 = vpack.c.bf16 %v261_v42, %v260_v41  ;;  %v328_v42 = vld [vmem:[%s2044_s6 + $0x340] sm:$0xff] }
 0x104   :  { %1317 = vmatpush3.bf16.msra.mxu1 %v1316_v48  ;;  %v263_v48 = vld [vmem:[%s2044_s6 + $0x138] sm:$0xff] }
 0x105   :  { %1319 = vmatprep.subr.bf16.mxu1 %v1318_v51  ;;  %v1288_v51 = vpack.c.bf16 %v263_v48, %v262_v47  ;;  %v330_v48 = vld [vmem:[%s2044_s6 + $0x350] sm:$0xff] }
 0x108   :  { %1321 = vmatpush3.bf16.msra.mxu1 %v1320_v54  ;;  %v265_v54 = vld [vmem:[%s2044_s6 + $0x148] sm:$0xff] }
 0x109   :  { %1323 = vmatprep.subr.bf16.mxu1 %v1322_v57  ;;  %v1292_v57 = vpack.c.bf16 %v265_v54, %v264_v53  ;;  %v332_v54 = vld [vmem:[%s2044_s6 + $0x360] sm:$0xff] }
 0x10c   :  { %1325 = vmatpush3.bf16.msra.mxu1 %v1324_v60  ;;  %v267_v60 = vld [vmem:[%s2044_s6 + $0x158] sm:$0xff] }
 0x10d   :  { %1327 = vmatprep.subr.bf16.mxu1 %v1326_v63  ;;  %v1296_v63 = vpack.c.bf16 %v267_v60, %v266_v59  ;;  %v334_v60 = vld [vmem:[%s2044_s6 + $0x370] sm:$0xff] }
 0x10e   :  { %v1368_v62 = vpack.c.bf16 %v335_v61, %v334_v60 }
 0x110   :  { %1329 = vmatpush3.bf16.msra.mxu1 %v1328_v3  ;;  %v269_v3 = vld [vmem:[%s2044_s6 + $0x168] sm:$0xff] }
 0x111   :  { %1331 = vmatprep.subr.bf16.mxu1 %v1330_v7  ;;  %v1300_v7 = vpack.c.bf16 %v269_v3, %v268_v2 }
 0x114   :  { %1333 = vmatpush3.bf16.msra.mxu1 %v1332_v10  ;;  %v270_v10 = vld [vmem:[%s2044_s6 + $0x170] sm:$0xff] }
 0x115   :  { %1335 = vmatprep.subr.bf16.mxu1 %v1334_v13  ;;  %v337_v13 = vld [vmem:[%s2044_s6 + $0x388] sm:$0xff]  ;;  %v1304_v14 = vpack.c.bf16 %v271_v11, %v270_v10 }
 0x116   :  { %v1338_v16 = vpack.c.bf16 %v337_v13, %v336_v12  ;;  %v770_v12 = vld [vmem:[%s2049_s9 + $0x20] sm:$0xff]  ;;  %v771_v13 = vld [vmem:[%s2049_s9 + $0x28] sm:$0xff] }
 0x118   :  { %1337 = vmatpush3.bf16.msra.mxu1 %v1336_v17  ;;  %v320_v17 = vld [vmem:[%s2044_s6 + $0x300] sm:$0xff] }
 0x119   :  { %1370 = vmatprep.subr.bf16.mxu1 %v1402_v4 }
 0x11b   :  { %682 = vmatmul.mubr.f32.vlgmr.msra.gmra.mrb[4].mxu1 %v459_v18  ;;  %v321_v18 = vld [vmem:[%s2044_s6 + $0x308] sm:$0xff] }
 0x11c   :  { %1196 = vmatprep.mubr.msk.f32.mxu1 %vm1401_vm2, %v1400_v0  ;;  %v1340_v21 = vpack.c.bf16 %v321_v18, %v320_v17  ;;  %v855_v18 = vld [vmem:[%s2050_s11] sm:$0xff] }
 0x1ae   :  { %v217_v27 = vpop.f32.mrb[0].mxu1 }
 0x1af   :  { %v218_v29 = vadd.f32 %v951_v23, %v217_v27  ;;  %v1160_v30 = vpop.f32.mrb[1].mxu1  ;;  %v468_v23 = vcombine.high %v1874_v15, %v1874_v15  ;;  %v323_v27 = vld [vmem:[%s2044_s6 + $0x318] sm:$0xff] }
 0x1b0   :  { %v1346_v30 = vpack.c.bf16 %v341_v28, %v340_v22 }
 0x1b1   :  { %v221_v33 = vmax.f32 %v218_v29, 0.0  ;;  %v1344_v29 = vpack.c.bf16 %v323_v27, %v322_v26  ;;  %v859_v26 = vld [vmem:[%s2050_s11 + $0x20] sm:$0xff]  ;;  %v860_v27 = vld [vmem:[%s2050_s11 + $0x28] sm:$0xff] }
 0x1b2   :  { %v1389_v22 = vpack.c.bf16 %v860_v27, %v859_v26 }
 0x1b3   :  { %1178 = vmatmul.mubr.msk.f32.vlgmr.msra.gmra.mrb[2].mxu0 %vm147_vm3, %v221_v33  ;;  %v342_v33 = vld [vmem:[%s2044_s6 + $0x3b0] sm:$0xff] }
 0x1b4   :  { %1277 = vmatpush3.bf16.msra.mxu0 %v1276_v31  ;;  %611 = vmatprep.mubr.f32.mxu0 %v451_v32  ;;  %v324_v31 = vld [vmem:[%s2044_s6 + $0x320] sm:$0xff]  ;;  %v325_v32 = vld [vmem:[%s2044_s6 + $0x328] sm:$0xff] }
 0x1b5   :  { %1279 = vmatprep.subr.bf16.mxu0 %v1278_v34  ;;  %v1348_v34 = vpack.c.bf16 %v325_v32, %v324_v31 }
 0x1b8   :  { %1281 = vmatpush3.bf16.msra.mxu0 %v1280_v39  ;;  %v345_v39 = vld [vmem:[%s2044_s6 + $0x3c8] sm:$0xff] }
 0x1b9   :  { %1283 = vmatprep.subr.bf16.mxu0 %v1282_v40  ;;  %v1352_v40 = vpack.c.bf16 %v327_v37, %v326_v36  ;;  %v1354_v41 = vpack.c.bf16 %v345_v39, %v344_v38  ;;  %v954_v38 = vld [vmem:[%s2051_s8] ss:$0 sm:$0xff] }
 0x1bc   :  { %1285 = vmatpush3.bf16.msra.mxu0 %v1284_v45  ;;  %v347_v45 = vld [vmem:[%s2044_s6 + $0x3d8] sm:$0xff] }
 0x1bd   :  { %1287 = vmatprep.subr.bf16.mxu0 %v1286_v46  ;;  %v1356_v46 = vpack.c.bf16 %v329_v43, %v328_v42  ;;  %v1358_v47 = vpack.c.bf16 %v347_v45, %v346_v44  ;;  %v862_v42 = vld [vmem:[%s2050_s11 + $0x38] sm:$0xff]  ;;  %v955_v44 = vld [vmem:[%s2052_s10] ss:$0 sm:$0xff] }
 0x1c0   :  { %1289 = vmatpush3.bf16.msra.mxu0 %v1288_v51  ;;  %v349_v51 = vld [vmem:[%s2044_s6 + $0x3e8] sm:$0xff] }
 0x1c1   :  { %1291 = vmatprep.subr.bf16.mxu0 %v1290_v52  ;;  %v1360_v52 = vpack.c.bf16 %v331_v49, %v330_v48  ;;  %v1362_v53 = vpack.c.bf16 %v349_v51, %v348_v50  ;;  %v957_v49 = vld [vmem:[%s2053_s12] ss:$0 sm:$0xff] }
 0x1c4   :  { %1293 = vmatpush3.bf16.msra.mxu0 %v1292_v57  ;;  %v351_v57 = vld [vmem:[%s2044_s6 + $0x3f8] sm:$0xff] }
 0x1c5   :  { %1295 = vmatprep.subr.bf16.mxu0 %v1294_v58  ;;  %v1364_v58 = vpack.c.bf16 %v333_v55, %v332_v54  ;;  %v1366_v59 = vpack.c.bf16 %v351_v57, %v350_v56 }
 0x1c8   :  { %1297 = vmatpush3.bf16.msra.mxu0 %v1296_v63 }
 0x1c9   :  { %1299 = vmatprep.subr.bf16.mxu0 %v1298_v1 }
 0x1cc   :  { %1301 = vmatpush3.bf16.msra.mxu0 %v1300_v7  ;;  %v766_v7 = vld [vmem:[%s2049_s9] sm:$0xff] }
 0x1cd   :  { %1303 = vmatprep.subr.bf16.mxu0 %v1302_v9  ;;  %v768_v9 = vld [vmem:[%s2049_s9 + $0x10] sm:$0xff]  ;;  %v1371_v10 = vpack.c.bf16 %v767_v8, %v766_v7 }
 0x1ce   :  { %v1011_v63 = vpop.f32.mrb[2].mxu1 }
 0x1cf   :  { %v1012_v1 = vpop.f32.mrb[3].mxu1  ;;  %1372 = vmatpush3.bf16.msra.mxu1 %v1371_v10 }
 0x1d0   :  { %1305 = vmatpush3.bf16.msra.mxu0 %v1304_v14  ;;  %v1013_v2 = vadd.f32 %v1012_v1, %v1011_v63  ;;  %1373 = vmatprep.subr.bf16.mxu1 %v1402_v4  ;;  %v1377_v14 = vpack.c.bf16 %v771_v13, %v770_v12 }
 0x1d1   :  { %1339 = vmatprep.subr.bf16.mxu0 %v1338_v16  ;;  %v773_v16 = vld [vmem:[%s2049_s9 + $0x38] sm:$0xff] }
 0x1d3   :  { %612 = vmatmul.mubr.f32.vlgmr.msra.gmra.mrb[4].mxu0 %v1770_v24  ;;  %v343_v24 = vld [vmem:[%s2044_s6 + $0x3b8] sm:$0xff] }
 0x1d4   :  { %1341 = vmatpush3.bf16.msra.mxu0 %v1340_v21  ;;  %751 = vmatprep.mubr.f32.mxu0 %v468_v23  ;;  %v1350_v35 = vpack.c.bf16 %v343_v24, %v342_v33  ;;  %v1383_v21 = vpack.c.bf16 %v856_v19, %v855_v18  ;;  %v858_v23 = vld [vmem:[%s2050_s11 + $0x18] sm:$0xff] }
 0x1d5   :  { %1343 = vmatprep.subr.bf16.mxu0 %v1342_v25  ;;  %v1386_v25 = vpack.c.bf16 %v858_v23, %v857_v20 }
 0x1d8   :  { %1345 = vmatpush3.bf16.msra.mxu0 %v1344_v29 }
 0x1d9   :  { %1347 = vmatprep.subr.bf16.mxu0 %v1346_v30 }
 0x1dc   :  { %1349 = vmatpush3.bf16.msra.mxu0 %v1348_v34 }
 0x1dd   :  { %1351 = vmatprep.subr.bf16.mxu0 %v1350_v35 }
 0x1e0   :  { %1353 = vmatpush3.bf16.msra.mxu0 %v1352_v40 }
 0x1e1   :  { %1355 = vmatprep.subr.bf16.mxu0 %v1354_v41 }
 0x1e4   :  { %1357 = vmatpush3.bf16.msra.mxu0 %v1356_v46 }
 0x1e5   :  { %1359 = vmatprep.subr.bf16.mxu0 %v1358_v47 }
 0x1e8   :  { %1361 = vmatpush3.bf16.msra.mxu0 %v1360_v52 }
 0x1e9   :  { %1363 = vmatprep.subr.bf16.mxu0 %v1362_v53 }
 0x1ec   :  { %1365 = vmatpush3.bf16.msra.mxu0 %v1364_v58 }
 0x1ed   :  { %1367 = vmatprep.subr.bf16.mxu0 %v1366_v59 }
 0x1ee   :  { %v1081_v3 = vpop.f32.mrb[4].mxu1 }
 0x1ef   :  { %v1082_v5 = vpop.f32.mrb[5].mxu1 }
 0x1f0   :  { %1369 = vmatpush3.bf16.msra.mxu0 %v1368_v62  ;;  %v1083_v6 = vadd.f32 %v1082_v5, %v1081_v3 }
 0x1f1   :  { %1382 = vmatprep.subr.bf16.mxu0 %v1402_v4 }
 0x1f3   :  { %752 = vmatmul.mubr.f32.vlgmr.msra.gmra.mrb[6].mxu0 %v1874_v15  ;;  %v772_v15 = vld [vmem:[%s2049_s9 + $0x30] sm:$0xff] }
 0x1f4   :  { %1215 = vmatprep.mubr.msk.f32.mxu0 %vm1401_vm2, %v1400_v0  ;;  %v769_v0 = vld [vmem:[%s2049_s9 + $0x18] sm:$0xff]  ;;  %v1380_v17 = vpack.c.bf16 %v773_v16, %v772_v15  ;;  %1384 = vmatpush3.bf16.msra.mxu0 %v1383_v21 }
 0x1f5   :  { %v1374_v11 = vpack.c.bf16 %v769_v0, %v768_v9  ;;  %1385 = vmatprep.subr.bf16.mxu0 %v1402_v4 }
 0x1f7   :  { %1375 = vmatpush3.bf16.msra.mxu1 %v1374_v11 }
 0x1f8   :  { %1376 = vmatprep.subr.bf16.mxu1 %v1402_v4  ;;  %1387 = vmatpush3.bf16.msra.mxu0 %v1386_v25 }
 0x1f9   :  { %1388 = vmatprep.subr.bf16.mxu0 %v1402_v4 }
 0x1fb   :  { %1378 = vmatpush3.bf16.msra.mxu1 %v1377_v14 }
 0x1fc   :  { %1379 = vmatprep.subr.bf16.mxu1 %v1402_v4  ;;  %1390 = vmatpush3.bf16.msra.mxu0 %v1389_v22 }
 0x1fd   :  { %1391 = vmatprep.subr.bf16.mxu0 %v1402_v4  ;;  %v861_v4 = vld [vmem:[%s2050_s11 + $0x30] sm:$0xff] }
 0x1fe   :  { %v1392_v43 = vpack.c.bf16 %v862_v42, %v861_v4 }
 0x1ff   :  { %1381 = vmatpush3.bf16.msra.mxu1 %v1380_v17 }
 0x200   :  { %1393 = vmatpush3.bf16.msra.mxu0 %v1392_v43 }
 0x286   :  { %v429_v28 = vpop.f32.mrb[2].mxu0 }
 0x287   :  { %v544_v29 = vadd.f32 %v1013_v2, %v429_v28  ;;  %v1179_v30 = vpop.f32.mrb[3].mxu0 }
 0x2a6   :  { %v1046_v31 = vpop.f32.mrb[4].mxu0 }
 0x2a7   :  { %v1047_v32 = vpop.f32.mrb[5].mxu0 }
 0x2a8   :  { %v1048_v33 = vadd.f32 %v1047_v32, %v1046_v31 }
 0x2aa   :  { %v614_v24 = vadd.f32 %v1048_v33, %v544_v29 }
 0x2ac   :  { %v684_v34 = vadd.f32 %v1083_v6, %v614_v24 }
 0x2c6   :  { %v1116_v35 = vpop.f32.mrb[6].mxu0 }
 0x2c7   :  { %v1117_v36 = vpop.f32.mrb[7].mxu0 }
 0x2c8   :  { %v1118_v37 = vadd.f32 %v1117_v36, %v1116_v35 }
 0x2ca   :  { %v754_v39 = vadd.f32 %v1118_v37, %v684_v34 }
 0x2cc   :  { %v764_v40 = vadd.f32 %v954_v38, %v754_v39 }
 0x2ce   :  { %v765_v41 = vmax.f32 %v764_v40, 0.0 }
 0x2d0   :  { %1197 = vmatmul.mubr.msk.f32.vlgmr.msra.gmra.mrb[6].mxu1 %vm147_vm3, %v765_v41 }
 0x3a3   :  { %v850_v45 = vpop.f32.mrb[6].mxu1 }
 0x3a4   :  { %v851_v46 = vadd.f32 %v955_v44, %v850_v45  ;;  %v1198_v47 = vpop.f32.mrb[7].mxu1 }
 0x3a6   :  { %v854_v48 = vmax.f32 %v851_v46, 0.0 }
 0x3a8   :  { %1216 = vmatmul.mubr.msk.f32.vlgmr.msra.gmra.mrb[8].mxu0 %vm147_vm3, %v854_v48 }
 0x47b   :  { %v939_v50 = vpop.f32.mrb[8].mxu0 }
 0x47c   :  { %v940_v51 = vadd.f32 %v957_v49, %v939_v50  ;;  %v1217_v52 = vpop.f32.mrb[9].mxu0 }
 0x47e   :  { %943 = vst [vmem:[%s2054_s13] sm:$0x3] %v940_v51 }

</bundles_post_ra>
